<compile_context>
chip_gen: v7x
topology: tpu7x:2x2x1
jax: 0.10.0
libtpu: 0.0.40
codegen_flags: <defaults>
</compile_context>

<pallas_src>
import math

import jax
import jax.numpy as jnp
from jax import lax
from jax.experimental import pallas as pl
from jax.experimental.pallas import tpu as pltpu


def _make_pam_kernel(n_valid, tk, needs_mask):
    """Build the PAM kernel body with static spatial-padding parameters."""

    def pam_kernel(gamma_ref, xq_ref, xk_ref, mqk_ref, wrow_ref, wv_ref, bv_ref,
                   o_ref, qm_scr, rmax_scr, rsum_scr, acc_scr):
        # Per-step shapes:
        #   xq_ref   : (C, TQ)  f32   query-position columns of x (also residual)
        #   xk_ref   : (C, TK)  bf16  key/value-position columns of x
        #   mqk_ref  : (C, C)   bf16  Wq^T Wk
        #   wrow_ref : (1, C)   f32   (Wk^T bq)^T
        #   wv_ref   : (C, C)   bf16  value 1x1-conv weight (out, in)
        #   bv_ref   : (C, 1)   f32   value 1x1-conv bias
        #   o_ref    : (C, TQ)  f32   lane-dense output block
        #   qm_scr   : (TQ, C)  bf16  cached  x_q^T M + w  (constant over KV steps)
        #   rmax_scr : (TQ, 1)  f32   running row max
        #   rsum_scr : (TQ, 1)  f32   running row sum of exp
        #   acc_scr  : (TQ, C)  f32   running  sum_j p[i,j] * x[:, j]
        ki = pl.program_id(2)

        @pl.when(ki == 0)
        def _init():
            # Query-side projection, once per (batch, query-tile), bf16 on MXU.
            # qm[i, c'] = sum_c xq[c, i] * M[c, c']  -- dim-0/dim-0 contraction,
            # no explicit transpose of the activation tile.
            xq_b = xq_ref[...].astype(jnp.bfloat16)                     # (C, TQ)
            qm = lax.dot_general(xq_b, mqk_ref[...],
                                 (((0,), (0,)), ((), ())),
                                 preferred_element_type=jnp.float32)    # (TQ, C)
            qm_scr[...] = (qm + wrow_ref[...]).astype(jnp.bfloat16)
            rmax_scr[...] = jnp.full_like(rmax_scr, -jnp.inf)
            rsum_scr[...] = jnp.zeros_like(rsum_scr)
            acc_scr[...] = jnp.zeros_like(acc_scr)

        xk_b = xk_ref[...]                                              # (C, TK) bf16

        # Energy tile (TQ, TK): full-depth (C) bf16 contraction on the MXU.
        e = jnp.dot(qm_scr[...], xk_b, preferred_element_type=jnp.float32)

        if needs_mask:
            # Padded key columns (global index >= n_valid) must not contribute
            # to the softmax.  Only the last key tile can contain padding.
            kidx = ki * tk + lax.broadcasted_iota(jnp.int32, e.shape, 1)
            e = jnp.where(kidx < n_valid, e, -jnp.inf)

        # Online softmax over the key axis (f32 statistics).
        m_prev = rmax_scr[...]                                          # (TQ, 1)
        m_new = jnp.maximum(m_prev, jnp.max(e, axis=-1, keepdims=True))
        alpha = jnp.exp(m_prev - m_new)                                 # (TQ, 1)
        p = jnp.exp(e - m_new)                                          # (TQ, TK)
        rsum_scr[...] = alpha * rsum_scr[...] + jnp.sum(p, axis=-1, keepdims=True)

        # acc[i, :] += sum_j p[i, j] * x[:, j]   (rhs-transposed bf16 matmul;
        # the value projection is deferred to the finalize step).
        px = lax.dot_general(p.astype(jnp.bfloat16), xk_b,
                             (((1,), (1,)), ((), ())),
                             preferred_element_type=jnp.float32)        # (TQ, C)
        acc_scr[...] = alpha * acc_scr[...] + px
        rmax_scr[...] = m_new

        @pl.when(ki == pl.num_programs(2) - 1)
        def _finalize():
            # ctx[i, :] = sum_j attn[i, j] * x[:, j]
            ctx = acc_scr[...] * pl.reciprocal(rsum_scr[...], approx=True)
            # out[c, i] = sum_a Wv[c, a] * ctx[i, a] + bv[c]   -> (C, TQ), bf16 MXU.
            out_cn = lax.dot_general(wv_ref[...], ctx.astype(jnp.bfloat16),
                                     (((1,), (1,)), ((), ())),
                                     preferred_element_type=jnp.float32)
            out_cn = out_cn + bv_ref[...]
            o_ref[...] = (gamma_ref[0] * out_cn + xq_ref[...]).astype(o_ref.dtype)

    return pam_kernel


def _default_tile(n):
    """Cross-generation default tile size.

    256 fits comfortably at C<=512 within v5e's 16 MiB default scoped VMEM and
    v7x's 64 MiB physical budget; on v6e (128 MiB VMEM) larger KV tiles
    (tk=512) can be passed explicitly.  Small inputs use 128 to limit padding.
    """
    return 256 if n >= 256 else 128


def pam_forward(x_nchw, wq, bq, wk, bk, wv, bv, gamma, *, tq=None, tk=None,
                vmem_limit_bytes=None):
    """PAM forward.

    x_nchw : (B, C, H, W) f32
    wq, wk : (C//8, C)  1x1-conv weights in PyTorch (out, in) layout
    bq, bk : (C//8,)
    wv     : (C, C)
    bv     : (C,)
    gamma  : (1,)
    """
    B, C, H, W = x_nchw.shape
    N = H * W
    x = x_nchw.reshape(B, C, N)        # channel-major layout kept (no transpose)

    tq = _default_tile(N) if tq is None else tq
    tk = _default_tile(N) if tk is None else tk
    assert tq % 128 == 0 and tk % 128 == 0, "tile sizes must be multiples of 128"

    # Pad the spatial axis up to a common multiple of the tiles.  Padded key
    # columns are masked to -inf inside the kernel; padded query columns are
    # sliced off below (their rows never produce NaNs: zero columns give finite
    # energies).
    g = math.lcm(tq, tk)
    n_pad = (-N) % g
    if n_pad:
        x = jnp.pad(x, ((0, 0), (0, 0), (0, n_pad)))
    n_padded = N + n_pad
    nq, nk = n_padded // tq, n_padded // tk

    # Key/value stream in bf16: the only operand re-fetched every KV step.
    x_kv = x.astype(jnp.bfloat16)

    # Fold the q/k projections (terms involving bk are constant per query row
    # and cancel under softmax over keys):
    #   energy = x_q^T (Wq^T Wk) x_k + (Wk^T bq) . x_k + row-const
    mqk = (wq.T @ wk).astype(jnp.bfloat16)     # (C, C)  bf16
    wrow = (wk.T @ bq).reshape(1, C)           # (1, C)  f32
    wv_b = wv.astype(jnp.bfloat16)             # (C, C)  bf16
    bv_col = bv.reshape(C, 1)                  # (C, 1)  f32

    kernel = _make_pam_kernel(n_valid=N, tk=tk, needs_mask=bool(n_pad))

    cp_kwargs = dict(dimension_semantics=("parallel", "parallel", "arbitrary"))
    if vmem_limit_bytes is not None:
        cp_kwargs["vmem_limit_bytes"] = vmem_limit_bytes

    out = pl.pallas_call(
        kernel,
        out_shape=jax.ShapeDtypeStruct((B, C, n_padded), x_nchw.dtype),
        grid=(B, nq, nk),
        in_specs=[
            pl.BlockSpec(memory_space=pltpu.SMEM),                      # gamma
            pl.BlockSpec((None, C, tq), lambda b, qi, ki: (b, 0, qi)),  # x (query cols, f32)
            pl.BlockSpec((None, C, tk), lambda b, qi, ki: (b, 0, ki)),  # x (key cols, bf16)
            pl.BlockSpec((C, C), lambda b, qi, ki: (0, 0),
                         pipeline_mode=pl.Buffered(1)),                 # Wq^T Wk
            pl.BlockSpec((1, C), lambda b, qi, ki: (0, 0),
                         pipeline_mode=pl.Buffered(1)),                 # (Wk^T bq)^T
            pl.BlockSpec((C, C), lambda b, qi, ki: (0, 0),
                         pipeline_mode=pl.Buffered(1)),                 # Wv
            pl.BlockSpec((C, 1), lambda b, qi, ki: (0, 0),
                         pipeline_mode=pl.Buffered(1)),                 # bv
        ],
        out_specs=pl.BlockSpec((None, C, tq), lambda b, qi, ki: (b, 0, qi)),
        scratch_shapes=[
            pltpu.VMEM((tq, C), jnp.bfloat16),   # cached query-side projection
            pltpu.VMEM((tq, 1), jnp.float32),    # running max
            pltpu.VMEM((tq, 1), jnp.float32),    # running sum
            pltpu.VMEM((tq, C), jnp.float32),    # context accumulator
        ],
        compiler_params=pltpu.CompilerParams(**cp_kwargs),
    )(gamma, x, x_kv, mqk, wrow, wv_b, bv_col)

    if n_pad:
        out = out[:, :, :N]
    return out.reshape(B, C, H, W)


def pam_reference(x_nchw, wq, bq, wk, bk, wv, bv, gamma):
    """Pure-JAX f32 reference mirroring the PyTorch forward exactly."""
    B, C, H, W = x_nchw.shape
    N = H * W
    hi = lax.Precision.HIGHEST
    x = x_nchw.reshape(B, C, N)                                       # (B, C, N)
    q = jnp.einsum('oc,bcn->bon', wq, x, precision=hi) + bq[None, :, None]
    k = jnp.einsum('oc,bcn->bon', wk, x, precision=hi) + bk[None, :, None]
    v = jnp.einsum('oc,bcn->bon', wv, x, precision=hi) + bv[None, :, None]
    energy = jnp.einsum('bci,bcj->bij', q, k, precision=hi)           # (B, N, N)
    attn = jax.nn.softmax(energy, axis=-1)
    out = jnp.einsum('bcj,bij->bci', v, attn, precision=hi)           # (B, C, N)
    out = gamma[0] * out + x
    return out.reshape(B, C, H, W)


if __name__ == "__main__":
    def run_case(key, B, C, H, W, tq=None, tk=None):
        Cq = max(C // 8, 1)
        kx, kwq, kbq, kwk, kbk, kwv, kbv = jax.random.split(key, 7)
        x = jax.random.normal(kx, (B, C, H, W), dtype=jnp.float32)
        # 1x1 Conv2d weights in PyTorch (out_channels, in_channels) layout.
        wq = jax.random.normal(kwq, (Cq, C), dtype=jnp.float32) * 0.1
        bq = jax.random.normal(kbq, (Cq,), dtype=jnp.float32) * 0.1
        wk = jax.random.normal(kwk, (Cq, C), dtype=jnp.float32) * 0.1
        bk = jax.random.normal(kbk, (Cq,), dtype=jnp.float32) * 0.1
        wv = jax.random.normal(kwv, (C, C), dtype=jnp.float32) * 0.1
        bv = jax.random.normal(kbv, (C,), dtype=jnp.float32) * 0.1
        # The module initializes gamma to 0 (out == x); use a nonzero value so
        # the attention path is actually exercised / validated.
        gamma = jnp.array([0.5], dtype=jnp.float32)

        out = pam_forward(x, wq, bq, wk, bk, wv, bv, gamma, tq=tq, tk=tk)
        jax.block_until_ready(out)

        ref = pam_reference(x, wq, bq, wk, bk, wv, bv, gamma)
        assert out.shape == (B, C, H, W)
        max_err = float(jnp.max(jnp.abs(out - ref)))
        # bf16 matmuls with f32 accumulation: ~1e-2-level agreement expected.
        assert jnp.allclose(out, ref, atol=3e-2, rtol=3e-2), (
            f"mismatch vs reference (B={B},C={C},H={H},W={W}): "
            f"max abs err = {max_err}")

    root = jax.random.PRNGKey(0)
    k1, k2 = jax.random.split(root)

    # Case 1: N = 256 with tq = tk = 128 -> multi-tile online-softmax
    # accumulation (2 query tiles x 2 key tiles per batch element).
    run_case(k1, B=2, C=16, H=16, W=16, tq=128, tk=128)

    # Case 2: N = 144 (not a multiple of 128) -> exercises the pad-to-256 +
    # masked-key fast path instead of the old full-(N,N) fallback.
    run_case(k2, B=2, C=32, H=12, W=12)

    print("KERNEL_OK")
</pallas_src>

<mosaic_0001>
module attributes {stable_mosaic.version = 11 : i64} {
  func.func @pam_kernel(%arg0: i32, %arg1: i32, %arg2: i32, %arg3: memref<1xf32, #tpu.memory_space<smem>>, %arg4: memref<1x16x128xf32, #tpu.memory_space<vmem>>, %arg5: memref<1x16x128xbf16, #tpu.memory_space<vmem>>, %arg6: memref<16x16xbf16, #tpu.memory_space<vmem>>, %arg7: memref<1x16xf32, #tpu.memory_space<vmem>>, %arg8: memref<16x16xbf16, #tpu.memory_space<vmem>>, %arg9: memref<16x1xf32, #tpu.memory_space<vmem>>, %arg10: memref<1x16x128xf32, #tpu.memory_space<vmem>>, %arg11: memref<128x16xbf16, #tpu.memory_space<vmem>>, %arg12: memref<128x1xf32, #tpu.memory_space<vmem>>, %arg13: memref<128x1xf32, #tpu.memory_space<vmem>>, %arg14: memref<128x16xf32, #tpu.memory_space<vmem>>) attributes {dimension_semantics = [#tpu.dimension_semantics<parallel>, #tpu.dimension_semantics<parallel>, #tpu.dimension_semantics<arbitrary>], iteration_bounds = array<i64: 2, 2, 2>, scalar_prefetch = 0 : i64, scratch_operands = 4 : i64, tpu.core_type = #tpu.core_type<tc>, window_params = [{transform_indices = @transform_0, window_bounds = array<i64: 1>}, {transform_indices = @transform_1, window_bounds = array<i64: 1, 16, 128>}, {transform_indices = @transform_2, window_bounds = array<i64: 1, 16, 128>}, {pipeline_mode = #tpu.pipeline_mode<synchronous>, transform_indices = @transform_3, window_bounds = array<i64: 16, 16>}, {pipeline_mode = #tpu.pipeline_mode<synchronous>, transform_indices = @transform_4, window_bounds = array<i64: 1, 16>}, {pipeline_mode = #tpu.pipeline_mode<synchronous>, transform_indices = @transform_5, window_bounds = array<i64: 16, 16>}, {pipeline_mode = #tpu.pipeline_mode<synchronous>, transform_indices = @transform_6, window_bounds = array<i64: 16, 1>}, {transform_indices = @transform_7, window_bounds = array<i64: 1, 16, 128>}]} {
    %c0_i32 = arith.constant 0 : i32
    %0 = arith.cmpi eq, %arg2, %c0_i32 : i32
    %1 = arith.extui %0 : i1 to i32
    %c0_i32_0 = arith.constant 0 : i32
    %2 = arith.cmpi ne, %1, %c0_i32_0 : i32
    scf.if %2 {
      %c0_21 = arith.constant 0 : index
      %c0_22 = arith.constant 0 : index
      %c0_23 = arith.constant 0 : index
      %33 = vector.load %arg4[%c0_21, %c0_22, %c0_23] : memref<1x16x128xf32, #tpu.memory_space<vmem>>, vector<1x16x128xf32>
      %34 = vector.shape_cast %33 : vector<1x16x128xf32> to vector<16x128xf32>
      %35 = arith.truncf %34 : vector<16x128xf32> to vector<16x128xbf16>
      %c0_24 = arith.constant 0 : index
      %c0_25 = arith.constant 0 : index
      %36 = vector.load %arg6[%c0_24, %c0_25] : memref<16x16xbf16, #tpu.memory_space<vmem>>, vector<16x16xbf16>
      %cst_26 = arith.constant dense<0.000000e+00> : vector<128x16xf32>
      %37 = tpu.matmul %35, %36, %cst_26 {dimension_numbers = #tpu.dot_dimension_numbers<[0], [0], [1], [1], [0, 1, 1, 1], [], []>} : vector<16x128xbf16>, vector<16x16xbf16>, vector<128x16xf32> -> vector<128x16xf32>
      %c0_27 = arith.constant 0 : index
      %c0_28 = arith.constant 0 : index
      %38 = vector.load %arg7[%c0_27, %c0_28] : memref<1x16xf32, #tpu.memory_space<vmem>>, vector<1x16xf32>
      %39 = vector.broadcast %38 : vector<1x16xf32> to vector<128x16xf32>
      %40 = arith.addf %37, %39 : vector<128x16xf32>
      %41 = arith.truncf %40 : vector<128x16xf32> to vector<128x16xbf16>
      %c0_29 = arith.constant 0 : index
      %c0_30 = arith.constant 0 : index
      %42 = vector.load %arg11[%c0_29, %c0_30] : memref<128x16xbf16, #tpu.memory_space<vmem>>, vector<128x16xbf16>
      tpu.vector_store %arg11[%c0_29, %c0_30], %41 {strides = array<i32>} : memref<128x16xbf16, #tpu.memory_space<vmem>>, vector<128x16xbf16>,
      %cst_31 = arith.constant 0xFF800000 : f32
      %43 = vector.broadcast %cst_31 : f32 to vector<128x1xf32>
      %c0_32 = arith.constant 0 : index
      %c0_33 = arith.constant 0 : index
      %44 = vector.load %arg12[%c0_32, %c0_33] : memref<128x1xf32, #tpu.memory_space<vmem>>, vector<128x1xf32>
      tpu.vector_store %arg12[%c0_32, %c0_33], %43 {strides = array<i32>} : memref<128x1xf32, #tpu.memory_space<vmem>>, vector<128x1xf32>,
      %cst_34 = arith.constant 0.000000e+00 : f32
      %45 = vector.broadcast %cst_34 : f32 to vector<128x1xf32>
      %c0_35 = arith.constant 0 : index
      %c0_36 = arith.constant 0 : index
      %46 = vector.load %arg13[%c0_35, %c0_36] : memref<128x1xf32, #tpu.memory_space<vmem>>, vector<128x1xf32>
      tpu.vector_store %arg13[%c0_35, %c0_36], %45 {strides = array<i32>} : memref<128x1xf32, #tpu.memory_space<vmem>>, vector<128x1xf32>,
      %cst_37 = arith.constant 0.000000e+00 : f32
      %47 = vector.broadcast %cst_37 : f32 to vector<128x16xf32>
      %c0_38 = arith.constant 0 : index
      %c0_39 = arith.constant 0 : index
      %48 = vector.load %arg14[%c0_38, %c0_39] : memref<128x16xf32, #tpu.memory_space<vmem>>, vector<128x16xf32>
      tpu.vector_store %arg14[%c0_38, %c0_39], %47 {strides = array<i32>} : memref<128x16xf32, #tpu.memory_space<vmem>>, vector<128x16xf32>,
    } else {
    }
    %c0 = arith.constant 0 : index
    %c0_1 = arith.constant 0 : index
    %c0_2 = arith.constant 0 : index
    %3 = vector.load %arg5[%c0, %c0_1, %c0_2] : memref<1x16x128xbf16, #tpu.memory_space<vmem>>, vector<1x16x128xbf16>
    %4 = vector.shape_cast %3 : vector<1x16x128xbf16> to vector<16x128xbf16>
    %c0_3 = arith.constant 0 : index
    %c0_4 = arith.constant 0 : index
    %5 = vector.load %arg11[%c0_3, %c0_4] : memref<128x16xbf16, #tpu.memory_space<vmem>>, vector<128x16xbf16>
    %cst = arith.constant dense<0.000000e+00> : vector<128x128xf32>
    %6 = tpu.matmul %5, %4, %cst {dimension_numbers = #tpu.dot_dimension_numbers<[1], [0], [0], [1], [0, 0, 1, 1], [], []>} : vector<128x16xbf16>, vector<16x128xbf16>, vector<128x128xf32> -> vector<128x128xf32>
    %c0_5 = arith.constant 0 : index
    %c0_6 = arith.constant 0 : index
    %7 = vector.load %arg12[%c0_5, %c0_6] : memref<128x1xf32, #tpu.memory_space<vmem>>, vector<128x1xf32>
    %cst_7 = arith.constant dense<0xFF800000> : vector<128xf32>
    %8 = vector.multi_reduction <maximumf>, %6, %cst_7 [1] : vector<128x128xf32> to vector<128xf32>
    %9 = vector.shape_cast %8 : vector<128xf32> to vector<128x1xf32>
    %10 = arith.maximumf %7, %9 : vector<128x1xf32>
    %11 = arith.subf %7, %10 : vector<128x1xf32>
    %12 = math.exp %11 : vector<128x1xf32>
    %13 = vector.broadcast %10 : vector<128x1xf32> to vector<128x128xf32>
    %14 = arith.subf %6, %13 : vector<128x128xf32>
    %15 = math.exp %14 : vector<128x128xf32>
    %c0_8 = arith.constant 0 : index
    %c0_9 = arith.constant 0 : index
    %16 = vector.load %arg13[%c0_8, %c0_9] : memref<128x1xf32, #tpu.memory_space<vmem>>, vector<128x1xf32>
    %17 = arith.mulf %12, %16 : vector<128x1xf32>
    %cst_10 = arith.constant dense<0.000000e+00> : vector<128xf32>
    %18 = vector.multi_reduction <add>, %15, %cst_10 [1] : vector<128x128xf32> to vector<128xf32>
    %19 = vector.shape_cast %18 : vector<128xf32> to vector<128x1xf32>
    %20 = arith.addf %17, %19 : vector<128x1xf32>
    %c0_11 = arith.constant 0 : index
    %c0_12 = arith.constant 0 : index
    %21 = vector.load %arg13[%c0_11, %c0_12] : memref<128x1xf32, #tpu.memory_space<vmem>>, vector<128x1xf32>
    tpu.vector_store %arg13[%c0_11, %c0_12], %20 {strides = array<i32>} : memref<128x1xf32, #tpu.memory_space<vmem>>, vector<128x1xf32>,
    %22 = arith.truncf %15 : vector<128x128xf32> to vector<128x128xbf16>
    %cst_13 = arith.constant dense<0.000000e+00> : vector<128x16xf32>
    %23 = tpu.matmul %22, %4, %cst_13 {dimension_numbers = #tpu.dot_dimension_numbers<[1], [1], [0], [0], [0, 0, 1, 0], [], []>} : vector<128x128xbf16>, vector<16x128xbf16>, vector<128x16xf32> -> vector<128x16xf32>
    %c0_14 = arith.constant 0 : index
    %c0_15 = arith.constant 0 : index
    %24 = vector.load %arg14[%c0_14, %c0_15] : memref<128x16xf32, #tpu.memory_space<vmem>>, vector<128x16xf32>
    %25 = vector.broadcast %12 : vector<128x1xf32> to vector<128x16xf32>
    %26 = arith.mulf %25, %24 : vector<128x16xf32>
    %27 = arith.addf %26, %23 : vector<128x16xf32>
    %c0_16 = arith.constant 0 : index
    %c0_17 = arith.constant 0 : index
    %28 = vector.load %arg14[%c0_16, %c0_17] : memref<128x16xf32, #tpu.memory_space<vmem>>, vector<128x16xf32>
    tpu.vector_store %arg14[%c0_16, %c0_17], %27 {strides = array<i32>} : memref<128x16xf32, #tpu.memory_space<vmem>>, vector<128x16xf32>,
    %c0_18 = arith.constant 0 : index
    %c0_19 = arith.constant 0 : index
    %29 = vector.load %arg12[%c0_18, %c0_19] : memref<128x1xf32, #tpu.memory_space<vmem>>, vector<128x1xf32>
    tpu.vector_store %arg12[%c0_18, %c0_19], %10 {strides = array<i32>} : memref<128x1xf32, #tpu.memory_space<vmem>>, vector<128x1xf32>,
    %c1_i32 = arith.constant 1 : i32
    %30 = arith.cmpi eq, %arg2, %c1_i32 : i32
    %31 = arith.extui %30 : i1 to i32
    %c0_i32_20 = arith.constant 0 : i32
    %32 = arith.cmpi ne, %31, %c0_i32_20 : i32
    scf.if %32 {
      %c0_21 = arith.constant 0 : index
      %c0_22 = arith.constant 0 : index
      %33 = vector.load %arg14[%c0_21, %c0_22] : memref<128x16xf32, #tpu.memory_space<vmem>>, vector<128x16xf32>
      %c0_23 = arith.constant 0 : index
      %c0_24 = arith.constant 0 : index
      %34 = vector.load %arg13[%c0_23, %c0_24] : memref<128x1xf32, #tpu.memory_space<vmem>>, vector<128x1xf32>
      %35 = tpu.reciprocal %34 {approx = true} : vector<128x1xf32> -> vector<128x1xf32>
      %36 = vector.broadcast %35 : vector<128x1xf32> to vector<128x16xf32>
      %37 = arith.mulf %33, %36 : vector<128x16xf32>
      %c0_25 = arith.constant 0 : index
      %c0_26 = arith.constant 0 : index
      %38 = vector.load %arg8[%c0_25, %c0_26] : memref<16x16xbf16, #tpu.memory_space<vmem>>, vector<16x16xbf16>
      %39 = arith.truncf %37 : vector<128x16xf32> to vector<128x16xbf16>
      %cst_27 = arith.constant dense<0.000000e+00> : vector<16x128xf32>
      %40 = tpu.matmul %38, %39, %cst_27 {dimension_numbers = #tpu.dot_dimension_numbers<[1], [1], [0], [0], [0, 0, 1, 0], [], []>} : vector<16x16xbf16>, vector<128x16xbf16>, vector<16x128xf32> -> vector<16x128xf32>
      %c0_28 = arith.constant 0 : index
      %c0_29 = arith.constant 0 : index
      %41 = vector.load %arg9[%c0_28, %c0_29] : memref<16x1xf32, #tpu.memory_space<vmem>>, vector<16x1xf32>
      %42 = vector.broadcast %41 : vector<16x1xf32> to vector<16x128xf32>
      %43 = arith.addf %40, %42 : vector<16x128xf32>
      %c0_30 = arith.constant 0 : index
      %44 = memref.load %arg3[%c0_30] : memref<1xf32, #tpu.memory_space<smem>>
      %45 = vector.broadcast %44 : f32 to vector<16x128xf32>
      %46 = arith.mulf %45, %43 : vector<16x128xf32>
      %c0_31 = arith.constant 0 : index
      %c0_32 = arith.constant 0 : index
      %c0_33 = arith.constant 0 : index
      %47 = vector.load %arg4[%c0_31, %c0_32, %c0_33] : memref<1x16x128xf32, #tpu.memory_space<vmem>>, vector<1x16x128xf32>
      %48 = vector.shape_cast %47 : vector<1x16x128xf32> to vector<16x128xf32>
      %49 = arith.addf %46, %48 : vector<16x128xf32>
      %c0_34 = arith.constant 0 : index
      %c0_35 = arith.constant 0 : index
      %c0_36 = arith.constant 0 : index
      %50 = vector.load %arg10[%c0_34, %c0_35, %c0_36] : memref<1x16x128xf32, #tpu.memory_space<vmem>>, vector<1x16x128xf32>
      %51 = vector.shape_cast %50 : vector<1x16x128xf32> to vector<16x128xf32>
      %52 = vector.shape_cast %49 : vector<16x128xf32> to vector<1x16x128xf32>
      tpu.vector_store %arg10[%c0_34, %c0_35, %c0_36], %52 {strides = array<i32>} : memref<1x16x128xf32, #tpu.memory_space<vmem>>, vector<1x16x128xf32>,
    } else {
    }
    return
  }
  func.func @transform_0(%arg0: i32, %arg1: i32, %arg2: i32) -> i32 {
    %c0_i32 = arith.constant 0 : i32
    %c0_i32_0 = arith.constant 0 : i32
    return %c0_i32 : i32
  }
  func.func @transform_1(%arg0: i32, %arg1: i32, %arg2: i32) -> (i32, i32, i32) {
    %c0_i32 = arith.constant 0 : i32
    %c0_i32_0 = arith.constant 0 : i32
    return %arg0, %c0_i32, %arg1 : i32, i32, i32
  }
  func.func @transform_2(%arg0: i32, %arg1: i32, %arg2: i32) -> (i32, i32, i32) {
    %c0_i32 = arith.constant 0 : i32
    %c0_i32_0 = arith.constant 0 : i32
    return %arg0, %c0_i32, %arg2 : i32, i32, i32
  }
  func.func @transform_3(%arg0: i32, %arg1: i32, %arg2: i32) -> (i32, i32) {
    %c0_i32 = arith.constant 0 : i32
    %c0_i32_0 = arith.constant 0 : i32
    %c0_i32_1 = arith.constant 0 : i32
    return %c0_i32, %c0_i32_0 : i32, i32
  }
  func.func @transform_4(%arg0: i32, %arg1: i32, %arg2: i32) -> (i32, i32) {
    %c0_i32 = arith.constant 0 : i32
    %c0_i32_0 = arith.constant 0 : i32
    %c0_i32_1 = arith.constant 0 : i32
    return %c0_i32, %c0_i32_0 : i32, i32
  }
  func.func @transform_5(%arg0: i32, %arg1: i32, %arg2: i32) -> (i32, i32) {
    %c0_i32 = arith.constant 0 : i32
    %c0_i32_0 = arith.constant 0 : i32
    %c0_i32_1 = arith.constant 0 : i32
    return %c0_i32, %c0_i32_0 : i32, i32
  }
  func.func @transform_6(%arg0: i32, %arg1: i32, %arg2: i32) -> (i32, i32) {
    %c0_i32 = arith.constant 0 : i32
    %c0_i32_0 = arith.constant 0 : i32
    %c0_i32_1 = arith.constant 0 : i32
    return %c0_i32, %c0_i32_0 : i32, i32
  }
  func.func @transform_7(%arg0: i32, %arg1: i32, %arg2: i32) -> (i32, i32, i32) {
    %c0_i32 = arith.constant 0 : i32
    %c0_i32_0 = arith.constant 0 : i32
    return %arg0, %c0_i32, %arg1 : i32, i32, i32
  }
}

</mosaic_0001>

<bundles_post_ra>
// kernel: tpu_custom_call.1
= control target key start
LH: loop header
LB: loop body
LE: loop exit
PB: predicated region body
PF: predicated region fallthrough
CT: control target
= control target key end

     0   :  { %s3178_s0 = inlined_call_operand.<no memory space> [shape: f32[1], index: 0, kind: input, shape index: {}]   ;;  %s3179_s1 = inlined_call_operand.hbm [shape: f32[2,16,256], index: 1, kind: input, shape index: {}]   ;;  %s3180_s2 = inlined_call_operand.hbm [shape: bf16[2,16,256], index: 2, kind: input, shape index: {}]   ;;  %s3181_s3 = inlined_call_operand.vmem [shape: bf16[16,16], index: 3, kind: input, shape index: {}]   ;;  %s3182_s4 = inlined_call_operand.vmem [shape: f32[1,16], index: 4, kind: input, shape index: {}]   ;;  %s3183_s5 = inlined_call_operand.vmem [shape: bf16[16,16], index: 5, kind: input, shape index: {}]   ;;  %s3184_s6 = inlined_call_operand.vmem [shape: f32[16,1], index: 6, kind: input, shape index: {}]   ;;  %s3185_s7 = inlined_call_operand.hbm [shape: f32[2,16,256], index: 7, kind: output, shape index: {}]  }
   0x1   :  { %3201 = sst [smem:[#allocation25_spill]] %s3179_s1 }
   0x2   :  { %3202 = sst [smem:[#allocation26_spill]] %s3185_s7 }
   0x3   :  { %12 = sst [smem:[#allocation6]] %s3178_s0 }
   0x4   :  { %13 = vsyncpa [#allocation8], 0 }
   0x5   :  { %15 = vsyncpa [#allocation8 + $0x1], 0 }
   0x6   :  { %16 = vsyncpa [#allocation11], 0 }
   0x7   :  { %18 = vsyncpa [#allocation11 + $0x1], 0 }
   0x8   :  { %19 = vsyncpa [#allocation9], 0 }
   0x9   :  { %21 = vsyncpa [#allocation9 + $0x1], 0  ;;  %s2377_s26 = smov 0   ;;  %s2379_s27 = smov 0  }
   0xa   :  { %s2381_s28 = smov 0   ;;  %s2383_s29 = smov 0  }
   0xb   :  { %s2385_s30 = smov 0   ;;  %s2387_s8 = smov 0  }
   0xc   :  { %s2389_s9 = smov 0   ;;  %s2391_s0 = smov 0  }
   0xd   :  { %s2393_s10 = smov 0   ;;  %s2395_s11 = smov 0  }
   0xe   :  { %s2397_s12 = smov 0   ;;  %s2399_s13 = smov 0  }
   0xf   :  { %s2401_s14 = smov 0  }
  0x10 LB: > { %3203 = sst [smem:[#allocation16_spill]] %s2279_s29  ;;  %s1718_s15 = sadd.s32 4294967295, %s2315_s14   ;;  %s2315_s14 = sphi %s2401_s14, %s27_s14   ;;  %s2311_s13 = sphi %s2399_s13, %s3255_s13   ;;  %s2307_s12 = sphi %s2397_s12, %s3247_s12   ;;  %s2303_s11 = sphi %s2395_s11, %s3246_s11   ;;  %s2299_s10 = sphi %s2393_s10, %s3254_s10   ;;  %s2295_s0 = sphi %s2391_s0, %s3245_s0   ;;  %s2291_s9 = sphi %s2389_s9, %s3244_s9   ;;  %s2287_s8 = sphi %s2387_s8, %s3253_s8   ;;  %s2283_s30 = sphi %s2385_s30, %s3252_s30   ;;  %s2279_s29 = sphi %s2383_s29, %s3251_s29   ;;  %s2275_s28 = sphi %s2381_s28, %s3250_s28   ;;  %s2271_s27 = sphi %s2379_s27, %s3249_s27   ;;  %s2267_s26 = sphi %s2377_s26, %s3248_s26  }
  0x11   : > { %3204 = sst [smem:[#allocation17_spill]] %s2295_s0  ;;  %s1719_s16 = sadd.s32 4294967294, %s2315_s14  }
  0x12   : > { %3205 = sst [smem:[#allocation18_spill]] %s2299_s10  ;;  %p83_p0 = scmp.ne.s32.totalorder %s2287_s8, %s2283_s30 }
  0x13   : > { %3206 = sst [smem:[#allocation19_spill]] %s2303_s11  ;;  %p3190_p1 = scmp.eq.s32.totalorder %s2315_s14, 0 }
  0x14   : > { %3207 = sst [smem:[#allocation20_spill]] %s2307_s12  ;;  %p89_p2 = scmp.ne.s32.totalorder %s2283_s30, %s2279_s29 }
  0x15   : > { %p2452_p3 = scmp.eq.s32.totalorder %s1718_s15, 0  ;;  %p227_p4 = scmp.eq.s32.totalorder %s1718_s15, 7 }
  0x16   : > { %p2458_p5 = por %p3190_p1, %p83_p0  ;;  %p233_p6 = scmp.eq.s32.totalorder %s1719_s16, 7 }
  0x17   : > { %p2464_p7 = por %p2452_p3, %p89_p2  ;;  %p2468_p8 = por %p227_p4, %p83_p0 }
  0x18   : > { %p2472_p9 = por %p233_p6, %p89_p2  ;;  %p3189_p10 = scmp.lt.s32.totalorder %s2315_s14, 8 }
  0x19   : > { %s3210_s22 = scalar_select %p2464_p7, 1, 0 }
  0x1a   : > { %s3211_s23 = scalar_select %p2468_p8, 1, 0 }
  0x1b   : > { %s3213_s24 = scalar_select %p2472_p9, 1, 0 }
  0x1c   : > { %3212 = sst [smem:[#allocation21_spill]] %s3211_s23  ;;  %s268_s25 = sand.u32 1, %s2287_s8  }
  0x1d   : > { %3214 = sst [smem:[#allocation22_spill]] %s3213_s24  ;;  %s1722_s15 = sshll.u32 %s268_s25, 4 }
  0x1e   : > { %s1723_s19 = sshll.u32 %s2311_s13, 2  ;;  %s272_s16 = scalar_lea.vmem [#allocation7], %s1722_s15 }
  0x1f   : > { %s277_s18 = sadd.s32 %s2307_s12, %s1723_s19  ;;  %s280_s17 = sshll.u32 %s272_s16, 4  ;;  %s2482_s17 = int_to_ptr.vmem [resolvable:$true] %s280_s17 }
  0x20   : > { %s1724_s29 = sshll.u32 %s277_s18, 7  ;;  %s3215_s1 = sld [smem:[#allocation25_spill]] }
  0x21   : > { %p2493_p11 = pnand %p3189_p10, %p2458_p5  ;;  %s2497_s18 = scalar_lea.sflag [#allocation8], %s268_s25 }
  0x23   : > { %p2115_p13 = pneg %p2493_p11 }
  0x26   : > { %s2487_s10 = scalar_lea.hbm %s3215_s1, %s1724_s29  ;;  %s2118_s0 = scalar_lea.hbm %s3215_s1, 1024 }
  0x27   : > { %s2113_s15 = scalar_lea.hbm %s2487_s10, 256  ;;  %p2119_p4 = scmp.lt.u32.totalorder %s2487_s10, %s3215_s1 }
  0x28   : > { %p2114_p12 = scmp.ne.s32.totalorder %s2487_s10, %s2113_s15  ;;  %p2120_p5 = scmp.lt.u32.totalorder %s2118_s0, %s2113_s15 }
  0x29   : > { %p2122_p10 = scmp.lt.u32.totalorder %s2113_s15, %s2487_s10 }
  0x2a   : > { %p2116_p0 = pnand %p2115_p13, %p2114_p12  ;;  %p2121_p6 = por %p2120_p5, %p2119_p4 }
  0x2c   : > { %p2117_p2 = pneg %p2116_p0  ;;  %p2123_p1 = por %p2122_p10, %p2121_p6 }
  0x2e   : > { %p2124_p9 = pnand %p2123_p1, %p2117_p2 }
  0x30   : > { %2127 = shalt.err (!%p2124_p9)
}
  0x31   : > { %s2128_s25 = scalar_lea.vmem %s2482_s17, 256  ;;  %s2317_s7 = smov [#allocation7]  }
  0x32   : > { %p2129_p12 = scmp.ne.s32.totalorder %s2482_s17, %s2128_s25  ;;  %s2133_s29 = sshll.u32 %s2317_s7, 4  ;;  %s2134_s29 = int_to_ptr.vmem [resolvable:$false] %s2133_s29 }
  0x33   : > { %s2135_s21 = scalar_lea.vmem %s2134_s29, 512  ;;  %p2136_p7 = scmp.lt.s32.totalorder %s2482_s17, %s2134_s29 }
  0x34   : > { %p2131_p0 = pnand %p2129_p12, %p2115_p13  ;;  %p2137_p4 = scmp.lt.s32.totalorder %s2135_s21, %s2128_s25 }
  0x36   : > { %p2132_p8 = pneg %p2131_p0  ;;  %p2138_p5 = por %p2137_p4, %p2136_p7 }
  0x38   : > { %p2139_p10 = pnand %p2138_p5, %p2132_p8 }
  0x3a   : > { %2142 = shalt.err (!%p2139_p10)
}
  0x3b   : > { %s2318_s15 = smov 256   ;;  %s3193_s0 = smov 128  }
  0x3c   : > { %s2320_s16 = smov 8   ;;  %p1728_p1 = scmp.ge.s32.totalorder %s2315_s14, 1 }
  0x3d   : > { %1881 = dma.hbm_to_vmem [thread:$0]  (!%p2493_p11), %s2487_s10, 256, %s2482_s17, %s2497_s18, %s2318_s15, %s3193_s0, %s2320_s16  }
  0x3e   : > { %p310_p7 = scmp.lt.s32.totalorder %s2315_s14, 9  ;;  %s39_s7 = sadd.s32 1, %s2303_s11 }
  0x3f   : > { %p40_p9 = scmp.ge.s32.totalorder %s39_s7, 2  ;;  %p111_p13 = scmp.ne.s32.totalorder %s2275_s28, %s2271_s27 }
  0x40   : > { %p2528_p8 = pnand %p1728_p1, %p310_p7  ;;  %p117_p2 = scmp.ne.s32.totalorder %s2271_s27, %s2267_s26 }
  0x41   : > { %s3257_s7 = smov (%p40_p9, %s39_s7), 0  ;;  %s3219_s24 = sadd.s32 1, %s2307_s12 }
  0x42   : > { %3218 = sst [smem:[#allocation23_spill]] %s3257_s7  ;;  %s3259_s24 = smov (!%p40_p9, %s3219_s24), %s2307_s12 }
  0x43   : > { %s100_s10 = ssub.s32 %s2303_s11, %s3257_s7  ;;  %p3220_p11 = scmp.eq.s32.totalorder %s2315_s14, 0 }
  0x44   : > { %p44_p12 = scmp.ge.s32.totalorder %s3259_s24, 2  ;;  %p2553_p0 = por %p117_p2, %p2452_p3 }
  0x45   : > { %p2547_p6 = por %p111_p13, %p3220_p11  ;;  %s290_s21 = sand.u32 1, %s2275_s28  }
  0x46   : > { %s3222_s18 = scalar_select %p2553_p0, 1, 0 }
  0x47   : > { %s299_s26 = sadd.s32 %s2303_s11, %s1723_s19  ;;  %s3261_s24 = smov (%p44_p12, %s3259_s24), 0 }
  0x48   : > { %3223 = sst [smem:[#allocation24_spill]] %s3261_s24  ;;  %s3224_s15 = sadd.s32 1, %s2311_s13 }
  0x49   : > { %s3263_s15 = smov (!%p44_p12, %s3224_s15), %s2311_s13  ;;  %s72_s16 = ssub.s32 %s2307_s12, %s3261_s24 }
  0x4a   : > { %p48_p4 = scmp.ge.s32.totalorder %s3263_s15, 2  ;;  %s1725_s20 = sshll.u32 %s290_s21, 3 }
  0x4b   : > { %s1727_s0 = sshll.u32 %s299_s26, 6  ;;  %s294_s7 = scalar_lea.vmem [#allocation10], %s1725_s20 }
  0x4c   : > { %s3265_s15 = smov (%p48_p4, %s3263_s15), 0  ;;  %s2573_s19 = scalar_lea.hbm %s3180_s2, %s1727_s0 }
  0x4d   : > { %s302_s11 = sshll.u32 %s294_s7, 4  ;;  %s71_s23 = ssub.s32 %s2311_s13, %s3265_s15  ;;  %s2577_s11 = int_to_ptr.vmem [resolvable:$true] %s302_s11 }
  0x4e   : > { %s73_s24 = sor.u32 %s72_s16, %s71_s23  ;;  %s101_s12 = sor.u32 %s100_s10, %s71_s23 }
  0x4f   : > { %p74_p3 = scmp.eq.s32.totalorder %s73_s24, 0  ;;  %p102_p5 = scmp.eq.s32.totalorder %s101_s12, 0 }
  0x50   : > { %p3225_p10 = scmp.lt.s32.totalorder %s2315_s14, 8  ;;  %s3227_s0 = sadd.s32 1, %s2287_s8 }
  0x51   : > { %s2590_s29 = scalar_select %p74_p3, %s2287_s8, %s3227_s0  }
  0x52   : > { %p2583_p1 = pnand %p3225_p10, %p2547_p6  ;;  %s3228_s7 = sadd.s32 1, %s2275_s28 }
  0x53   : > { %s2595_s26 = scalar_select %p102_p5, %s2275_s28, %s3228_s7  }
  0x54   : > { %s2597_s20 = scalar_lea.sflag [#allocation11], %s290_s21  ;;  %s2143_s23 = scalar_lea.hbm %s2573_s19, 128 }
  0x55   : > { %p2144_p7 = scmp.ne.s32.totalorder %s2573_s19, %s2143_s23  ;;  %p2145_p9 = pneg %p2583_p1 }
  0x56   : > { %s2148_s10 = scalar_lea.hbm %s3180_s2, 512  ;;  %p2149_p11 = scmp.lt.u32.totalorder %s2573_s19, %s3180_s2 }
  0x57   : > { %p2146_p13 = pnand %p2145_p9, %p2144_p7  ;;  %p2150_p6 = scmp.lt.u32.totalorder %s2148_s10, %s2143_s23 }
  0x58   : > { %p2152_p4 = scmp.lt.u32.totalorder %s2143_s23, %s2573_s19 }
  0x59   : > { %p2147_p2 = pneg %p2146_p13  ;;  %p2151_p12 = por %p2150_p6, %p2149_p11 }
  0x5b   : > { %p2153_p3 = por %p2152_p4, %p2151_p12 }
  0x5d   : > { %p2154_p5 = pnand %p2153_p3, %p2147_p2 }
  0x5f   : > { %2157 = shalt.err (!%p2154_p5)
}
  0x60   : > { %s2158_s21 = scalar_lea.vmem %s2577_s11, 128  ;;  %s2321_s0 = smov [#allocation10]  }
  0x61   : > { %p2159_p10 = scmp.ne.s32.totalorder %s2577_s11, %s2158_s21  ;;  %s2163_s7 = sshll.u32 %s2321_s0, 4  ;;  %s2164_s7 = int_to_ptr.vmem [resolvable:$false] %s2163_s7 }
  0x62   : > { %s2165_s12 = scalar_lea.vmem %s2164_s7, 256  ;;  %p2166_p0 = scmp.lt.s32.totalorder %s2577_s11, %s2164_s7 }
  0x63   : > { %p2161_p7 = pnand %p2159_p10, %p2145_p9  ;;  %p2167_p11 = scmp.lt.s32.totalorder %s2165_s12, %s2158_s21 }
  0x65   : > { %p2162_p13 = pneg %p2161_p7  ;;  %p2168_p6 = por %p2167_p11, %p2166_p0 }
  0x67   : > { %p2169_p12 = pnand %p2168_p6, %p2162_p13 }
  0x69   : > { %2172 = shalt.err (!%p2169_p12)
}
  0x6a   : > { %s2322_s23 = smov 64   ;;  %s2323_s24 = smov 4  }
  0x6b   : > { %s3229_s10 = smov 128   ;;  %314 = sbr.rel (%p2528_p8) target bundleno = 1666 (0x682), region = 48 }
  0x6c   : > { %1884 = dma.hbm_to_vmem [thread:$0]  (!%p2583_p1), %s2573_s19, 128, %s2577_s11, %s2597_s20, %s3229_s10, %s2322_s23, %s2323_s24  }
  0x6d   : > { %s2629_s17 = sand.u32 (!%p2528_p8), 1, %s2283_s30   ;;  %p3230_p0 = scmp.ne.s32.totalorder (!%p2528_p8), %s3210_s22, 0 }
  0x6e   : > { %s1729_s16 = sshll.u32 (!%p2528_p8), %s2629_s17, 4  ;;  %s317_s21 = scalar_lea.sflag (!%p2528_p8), [#allocation8], %s2629_s17 }
  0x6f   : > { %s2633_s0 = scalar_lea.vmem (!%p2528_p8), [#allocation7], %s1729_s16 }
  0x72   : > { %2254 = dma.done.wait (%p3230_p0), %s317_s21, 256  }
  0x73   : > { %2256 = vsyncadd (%p3230_p0), %s317_s21, 4294967040  ;;  %s325_s11 = sand.u32 1, %s2271_s27   ;;  %p3231_p8 = scmp.ne.s32.totalorder %s3222_s18, 0 }
  0x74   : > { %s2640_s25 = sshll.u32 %s325_s11, 3  ;;  %s326_s19 = scalar_lea.sflag [#allocation11], %s325_s11 }
  0x75   : > { %s329_s1 = scalar_lea.vmem [#allocation10], %s2640_s25 }
  0x76   : > { %2258 = dma.done.wait (%p3231_p8), %s326_s19, 128  }
  0x77   : > { %2260 = vsyncadd (%p3231_p8), %s326_s19, 4294967168  ;;  %s2647_s20 = scalar_lea.vmem [#allocation12], %s1729_s16  ;;  %p1732_p1 = scmp.ne.s32.totalorder %s2291_s9, 0 }
  0x78   : > { %v370_v0 = vld [vmem:[%s2633_s0] sm:$0xff] (!%p1732_p1)  ;;  %v371_v1 = vld [vmem:[%s2633_s0 + $0x8] sm:$0xff] (!%p1732_p1)  ;;  %vm404_vm0 = vcmask (!%p1732_p1), 130048   ;;  %vm542_vm1 = vcmask (!%p1732_p1), 7168   ;;  %v2324_v4 = vmov (!%p1732_p1), -inf   ;;  %v2325_v5 = vmov (!%p1732_p1), 0.0  }
  0x79   : > { %369 = sbr.rel (%p1732_p1) target bundleno = 474 (0x1da), region = 60  ;;  %v372_v2 = vpack.c.bf16 (!%p1732_p1), %v371_v1, %v370_v0  ;;  %v2010_v3 = vld [vmem:[%s3181_s3] sm:$0xff] (!%p1732_p1)   ;;  %543 = vst.msk [vmem:[#allocation3] sm:$0xff] (!%p1732_p1), %vm542_vm1, %v2324_v4  ;;  %544 = vst.msk [vmem:[#allocation3 + $0x8] sm:$0xff] (!%p1732_p1), %vm542_vm1, %v2324_v4 }
  0x7a   : > { %545 = vst.msk [vmem:[#allocation3 + $0x10] sm:$0xff] (!%p1732_p1), %vm542_vm1, %v2324_v4  ;;  %546 = vst.msk [vmem:[#allocation3 + $0x18] sm:$0xff] (!%p1732_p1), %vm542_vm1, %v2324_v4  ;;  %1796 = vmatprep.subr.bf16.mxu0 (!%p1732_p1), %v2010_v3  ;;  %1870 = vmatprep.subr.bf16.mxu1 (!%p1732_p1), %v2010_v3  ;;  %v1733_v15 = vld [vmem:[%s3182_s4] ss:$0 sm:$0xff] (!%p1732_p1) }
  0x7b   : > { %547 = vst.msk [vmem:[#allocation3 + $0x20] sm:$0xff] (!%p1732_p1), %vm542_vm1, %v2324_v4  ;;  %548 = vst.msk [vmem:[#allocation3 + $0x28] sm:$0xff] (!%p1732_p1), %vm542_vm1, %v2324_v4  ;;  %382 = vxpose.xlu0.c.b16.start.end [1/1] (short) (!%p1732_p1), %v372_v2, 128  ;;  %1797 = vmatpush3.bf16.msra.mxu0 (!%p1732_p1), %v2010_v3 }
  0x7c   : > { %549 = vst.msk [vmem:[#allocation3 + $0x30] sm:$0xff] (!%p1732_p1), %vm542_vm1, %v2324_v4  ;;  %550 = vst.msk [vmem:[#allocation3 + $0x38] sm:$0xff] (!%p1732_p1), %vm542_vm1, %v2324_v4  ;;  %1871 = vmatpush3.bf16.msra.mxu1 (!%p1732_p1), %v2010_v3 }
  0x7d   : > { %551 = vst.msk [vmem:[#allocation3 + $0x40] sm:$0xff] (!%p1732_p1), %vm542_vm1, %v2324_v4  ;;  %552 = vst.msk [vmem:[#allocation3 + $0x48] sm:$0xff] (!%p1732_p1), %vm542_vm1, %v2324_v4 }
  0x7e   : > { %553 = vst.msk [vmem:[#allocation3 + $0x50] sm:$0xff] (!%p1732_p1), %vm542_vm1, %v2324_v4  ;;  %554 = vst.msk [vmem:[#allocation3 + $0x58] sm:$0xff] (!%p1732_p1), %vm542_vm1, %v2324_v4 }
  0x7f   : > { %555 = vst.msk [vmem:[#allocation3 + $0x60] sm:$0xff] (!%p1732_p1), %vm542_vm1, %v2324_v4  ;;  %556 = vst.msk [vmem:[#allocation3 + $0x68] sm:$0xff] (!%p1732_p1), %vm542_vm1, %v2324_v4 }
  0x80   : > { %557 = vst.msk [vmem:[#allocation3 + $0x70] sm:$0xff] %vm542_vm1, %v2324_v4  ;;  %558 = vst.msk [vmem:[#allocation3 + $0x78] sm:$0xff] %vm542_vm1, %v2324_v4 }
  0x81   : > { %559 = vst.msk [vmem:[#allocation4] sm:$0xff] %vm542_vm1, %v2325_v5  ;;  %560 = vst.msk [vmem:[#allocation4 + $0x8] sm:$0xff] %vm542_vm1, %v2325_v5 }
  0x82   : > { %561 = vst.msk [vmem:[#allocation4 + $0x10] sm:$0xff] %vm542_vm1, %v2325_v5  ;;  %562 = vst.msk [vmem:[#allocation4 + $0x18] sm:$0xff] %vm542_vm1, %v2325_v5 }
  0x83   : > { %563 = vst.msk [vmem:[#allocation4 + $0x20] sm:$0xff] %vm542_vm1, %v2325_v5  ;;  %564 = vst.msk [vmem:[#allocation4 + $0x28] sm:$0xff] %vm542_vm1, %v2325_v5 }
  0x84   : > { %565 = vst.msk [vmem:[#allocation4 + $0x30] sm:$0xff] %vm542_vm1, %v2325_v5  ;;  %566 = vst.msk [vmem:[#allocation4 + $0x38] sm:$0xff] %vm542_vm1, %v2325_v5 }
  0x85   : > { %567 = vst.msk [vmem:[#allocation4 + $0x40] sm:$0xff] %vm542_vm1, %v2325_v5  ;;  %568 = vst.msk [vmem:[#allocation4 + $0x48] sm:$0xff] %vm542_vm1, %v2325_v5 }
  0x86   : > { %569 = vst.msk [vmem:[#allocation4 + $0x50] sm:$0xff] %vm542_vm1, %v2325_v5  ;;  %570 = vst.msk [vmem:[#allocation4 + $0x58] sm:$0xff] %vm542_vm1, %v2325_v5 }
  0x87   : > { %571 = vst.msk [vmem:[#allocation4 + $0x60] sm:$0xff] %vm542_vm1, %v2325_v5  ;;  %572 = vst.msk [vmem:[#allocation4 + $0x68] sm:$0xff] %vm542_vm1, %v2325_v5 }
  0x88   : > { %573 = vst.msk [vmem:[#allocation4 + $0x70] sm:$0xff] %vm542_vm1, %v2325_v5  ;;  %574 = vst.msk [vmem:[#allocation4 + $0x78] sm:$0xff] %vm542_vm1, %v2325_v5 }
  0x89   : > { %575 = vst.msk [vmem:[#allocation5] sm:$0xff] %vm404_vm0, %v2325_v5  ;;  %576 = vst.msk [vmem:[#allocation5 + $0x8] sm:$0xff] %vm404_vm0, %v2325_v5 }
  0x8a   : > { %577 = vst.msk [vmem:[#allocation5 + $0x10] sm:$0xff] %vm404_vm0, %v2325_v5  ;;  %578 = vst.msk [vmem:[#allocation5 + $0x18] sm:$0xff] %vm404_vm0, %v2325_v5 }
  0x8b   : > { %579 = vst.msk [vmem:[#allocation5 + $0x20] sm:$0xff] %vm404_vm0, %v2325_v5  ;;  %580 = vst.msk [vmem:[#allocation5 + $0x28] sm:$0xff] %vm404_vm0, %v2325_v5 }
  0x8c   : > { %581 = vst.msk [vmem:[#allocation5 + $0x30] sm:$0xff] %vm404_vm0, %v2325_v5  ;;  %582 = vst.msk [vmem:[#allocation5 + $0x38] sm:$0xff] %vm404_vm0, %v2325_v5 }
  0x8d   : > { %583 = vst.msk [vmem:[#allocation5 + $0x40] sm:$0xff] %vm404_vm0, %v2325_v5  ;;  %584 = vst.msk [vmem:[#allocation5 + $0x48] sm:$0xff] %vm404_vm0, %v2325_v5 }
  0x8e   : > { %585 = vst.msk [vmem:[#allocation5 + $0x50] sm:$0xff] %vm404_vm0, %v2325_v5  ;;  %586 = vst.msk [vmem:[#allocation5 + $0x58] sm:$0xff] %vm404_vm0, %v2325_v5 }
  0x8f   : > { %587 = vst.msk [vmem:[#allocation5 + $0x60] sm:$0xff] %vm404_vm0, %v2325_v5  ;;  %588 = vst.msk [vmem:[#allocation5 + $0x68] sm:$0xff] %vm404_vm0, %v2325_v5 }
  0x90   : > { %589 = vst.msk [vmem:[#allocation5 + $0x70] sm:$0xff] %vm404_vm0, %v2325_v5  ;;  %590 = vst.msk [vmem:[#allocation5 + $0x78] sm:$0xff] %vm404_vm0, %v2325_v5 }
  0xe1   : > { %v390_v6 = vpop.trf.xlu0 }
  0xe2   : > { %1798 = vmatprep.mubr.msk.bf16.mxu0 %vm404_vm0, %v390_v6 }
  0xe5   : > { %v391_v7 = vpop.trf.xlu0 }
  0xe6   : > { %1799 = vmatmul.mubr.msk.bf16.vlgmr.msra.gmra.mrb[0].mxu0 %vm404_vm0, %v391_v7 }
  0xe9   : > { %v392_v8 = vpop.trf.xlu0 }
  0xea   : > { %1802 = vmatprep.mubr.msk.bf16.mxu0 %vm404_vm0, %v392_v8 }
  0xed   : > { %v393_v9 = vpop.trf.xlu0 }
  0xee   : > { %1803 = vmatmul.mubr.msk.bf16.gmra.mrb[4].mxu0 %vm404_vm0, %v393_v9 }
  0xf1   : > { %v394_v10 = vpop.trf.xlu0 }
  0xf2   : > { %1806 = vmatprep.mubr.msk.bf16.mxu1 %vm404_vm0, %v394_v10 }
  0xf5   : > { %v395_v11 = vpop.trf.xlu0 }
  0xf6   : > { %1807 = vmatmul.mubr.msk.bf16.vlgmr.msra.gmra.mrb[0].mxu1 %vm404_vm0, %v395_v11 }
  0xf9   : > { %v396_v12 = vpop.trf.xlu0 }
  0xfa   : > { %1810 = vmatprep.mubr.msk.bf16.mxu1 %vm404_vm0, %v396_v12 }
  0xfd   : > { %v397_v13 = vpop.trf.xlu0 }
  0xfe   : > { %1811 = vmatmul.mubr.msk.bf16.gmra.mrb[4].mxu1 %vm404_vm0, %v397_v13 }
 0x1b9   : > { %v1800_v14 = vpop.f32.mrb[0].mxu0 }
 0x1ba   : > { %v463_v16 = vpop.f32.mrb[1].mxu0  ;;  %v472_v18 = vadd.f32 %v1800_v14, %v1733_v15 }
 0x1bb   : > { %v1801_v17 = vpop.f32.mrb[2].mxu0  ;;  %v464_v21 = vadd.f32 %v1733_v15, %v463_v16 }
 0x1bc   : > { %v475_v19 = vadd.f32 %v1801_v17, %v1733_v15  ;;  %v466_v20 = vpop.f32.mrb[3].mxu0 }
 0x1bd   : > { %v467_v22 = vadd.f32 %v1733_v15, %v466_v20 }
 0x1be   : > { %v527_v23 = vpack.c.bf16 %v475_v19, %v472_v18 }
 0x1bf   : > { %v526_v24 = vpack.c.bf16 %v467_v22, %v464_v21 }
 0x1c0   : > { %535 = vst.msk [vmem:[#allocation2 + $0x8] sm:$0xff] %vm404_vm0, %v527_v23 }
 0x1c1   : > { %534 = vst.msk [vmem:[#allocation2] sm:$0xff] %vm404_vm0, %v526_v24  ;;  %v1804_v25 = vpop.f32.mrb[4].mxu0 }
 0x1c2   : > { %v479_v26 = vpop.f32.mrb[5].mxu0  ;;  %v488_v28 = vadd.f32 %v1804_v25, %v1733_v15 }
 0x1c3   : > { %v1805_v27 = vpop.f32.mrb[6].mxu0  ;;  %v480_v31 = vadd.f32 %v1733_v15, %v479_v26 }
 0x1c4   : > { %v491_v29 = vadd.f32 %v1805_v27, %v1733_v15  ;;  %v482_v30 = vpop.f32.mrb[7].mxu0 }
 0x1c5   : > { %v483_v32 = vadd.f32 %v1733_v15, %v482_v30 }
 0x1c6   : > { %v529_v33 = vpack.c.bf16 %v491_v29, %v488_v28 }
 0x1c7   : > { %v528_v34 = vpack.c.bf16 %v483_v32, %v480_v31 }
 0x1c8   : > { %537 = vst.msk [vmem:[#allocation2 + $0x18] sm:$0xff] %vm404_vm0, %v529_v33 }
 0x1c9   : > { %536 = vst.msk [vmem:[#allocation2 + $0x10] sm:$0xff] %vm404_vm0, %v528_v34  ;;  %v1808_v35 = vpop.f32.mrb[0].mxu1 }
 0x1ca   : > { %v495_v36 = vpop.f32.mrb[1].mxu1  ;;  %v504_v38 = vadd.f32 %v1808_v35, %v1733_v15 }
 0x1cb   : > { %v1809_v37 = vpop.f32.mrb[2].mxu1  ;;  %v496_v41 = vadd.f32 %v1733_v15, %v495_v36 }
 0x1cc   : > { %v507_v39 = vadd.f32 %v1809_v37, %v1733_v15  ;;  %v498_v40 = vpop.f32.mrb[3].mxu1 }
 0x1cd   : > { %v499_v42 = vadd.f32 %v1733_v15, %v498_v40 }
 0x1ce   : > { %v531_v43 = vpack.c.bf16 %v507_v39, %v504_v38 }
 0x1cf   : > { %v530_v44 = vpack.c.bf16 %v499_v42, %v496_v41 }
 0x1d0   : > { %539 = vst.msk [vmem:[#allocation2 + $0x28] sm:$0xff] %vm404_vm0, %v531_v43 }
 0x1d1   : > { %538 = vst.msk [vmem:[#allocation2 + $0x20] sm:$0xff] %vm404_vm0, %v530_v44  ;;  %v1812_v45 = vpop.f32.mrb[4].mxu1 }
 0x1d2   : > { %v511_v46 = vpop.f32.mrb[5].mxu1  ;;  %v520_v48 = vadd.f32 %v1812_v45, %v1733_v15 }
 0x1d3   : > { %v1813_v47 = vpop.f32.mrb[6].mxu1  ;;  %v512_v51 = vadd.f32 %v1733_v15, %v511_v46 }
 0x1d4   : > { %v523_v49 = vadd.f32 %v1813_v47, %v1733_v15  ;;  %v514_v50 = vpop.f32.mrb[7].mxu1 }
 0x1d5   : > { %v515_v52 = vadd.f32 %v1733_v15, %v514_v50 }
 0x1d6   : > { %v533_v53 = vpack.c.bf16 %v523_v49, %v520_v48 }
 0x1d7   : > { %v532_v54 = vpack.c.bf16 %v515_v52, %v512_v51 }
 0x1d8   : > { %541 = vst.msk [vmem:[#allocation2 + $0x38] sm:$0xff] %vm404_vm0, %v533_v53 }
 0x1d9   : > { %540 = vst.msk [vmem:[#allocation2 + $0x30] sm:$0xff] %vm404_vm0, %v532_v54 }
 0x1da PF: > { %v2013_v55 = vld [vmem:[%s329_s1] sm:$0xff]   ;;  %vm607_vm2 = vcmask 130048   ;;  %v595_v58 = vld [vmem:[#allocation2 + $0x10] sm:$0xff]  ;;  %v596_v59 = vld [vmem:[#allocation2 + $0x18] sm:$0xff]  ;;  %v2326_v9 = vmov 0   ;;  %vm1049_vm3 = vcmask 7168  }
 0x1db   : > { %v593_v56 = vld [vmem:[#allocation2] sm:$0xff]  ;;  %1814 = vmatprep.subr.bf16.mxu0 %v2013_v55  ;;  %v594_v57 = vld [vmem:[#allocation2 + $0x8] sm:$0xff]  ;;  %1832 = vmatprep.subr.bf16.mxu1 %v2013_v55  ;;  %v2780_v17 = vld [vmem:[#allocation3 + $0x10] sm:$0xff]  ;;  %p1752_p9 = scmp.ne.s32.totalorder %s2291_s9, 1 }
 0x1dc   : > { %1816 = vmatprep.mubr.msk.bf16.mxu0 %vm607_vm2, %v593_v56  ;;  %1815 = vmatpush3.bf16.msra.mxu0 %v2013_v55  ;;  %v597_v60 = vld [vmem:[#allocation2 + $0x20] sm:$0xff]  ;;  %v598_v61 = vld [vmem:[#allocation2 + $0x28] sm:$0xff]  ;;  %v2785_v23 = vld [vmem:[#allocation3 + $0x18] sm:$0xff]  ;;  %vm2329_vm4 = vmmov (!%p1752_p9), 0   ;;  %s1574_s11 = sld [smem:[#allocation6]] (!%p1752_p9) }
 0x1dd   : > { %1833 = vmatpush3.bf16.xpose.msra.mxu1 %v2013_v55  ;;  %2012 = vset.pattern.permute.xlu1 %v2326_v9  ;;  %v729_v18 = vld [vmem:[#allocation3] sm:$0xff]  ;;  %v2790_v24 = vld [vmem:[#allocation3 + $0x8] sm:$0xff]  ;;  %v2802_v30 = vld [vmem:[#allocation3 + $0x38] sm:$0xff] }
 0x1de   : > { %2011 = vset.pattern.permute.xlu0 %v2326_v9  ;;  %v2798_v29 = vld [vmem:[#allocation3 + $0x20] sm:$0xff]  ;;  %v2811_v35 = vld [vmem:[#allocation3 + $0x30] sm:$0xff]  ;;  %v734_v36 = vld [vmem:[#allocation3 + $0x28] sm:$0xff] }
 0x1df   : > { %1817 = vmatmul.mubr.msk.bf16.vlgmr.msra.gmra.mrb[0].mxu0 %vm607_vm2, %v594_v57  ;;  %v600_v63 = vld [vmem:[#allocation2 + $0x38] sm:$0xff]  ;;  %v2820_v41 = vld [vmem:[#allocation3 + $0x40] sm:$0xff]  ;;  %v2834_v47 = vld [vmem:[#allocation3 + $0x50] sm:$0xff] }
 0x1e0   : > { %1820 = vmatprep.mubr.msk.bf16.mxu0 %vm607_vm2, %v595_v58  ;;  %v599_v62 = vld [vmem:[#allocation2 + $0x30] sm:$0xff]  ;;  %v2825_v42 = vld [vmem:[#allocation3 + $0x58] sm:$0xff]  ;;  %v2839_v48 = vld [vmem:[#allocation3 + $0x48] sm:$0xff] }
 0x1e1   : > { %v2847_v54 = vld [vmem:[#allocation3 + $0x60] sm:$0xff]  ;;  %v2851_v55 = vld [vmem:[#allocation3 + $0x78] sm:$0xff] }
 0x1e7   : > { %1821 = vmatmul.mubr.msk.bf16.gmra.mrb[4].mxu0 %vm607_vm2, %v596_v59 }
 0x1e8   : > { %1824 = vmatprep.mubr.msk.bf16.mxu0 %vm607_vm2, %v597_v60 }
 0x1ef   : > { %1825 = vmatmul.mubr.msk.bf16.gmra.mrb[8].mxu0 %vm607_vm2, %v598_v61 }
 0x1f0   : > { %1828 = vmatprep.mubr.msk.bf16.mxu0 %vm607_vm2, %v599_v62  ;;  %v2861_v62 = vld [vmem:[#allocation3 + $0x70] sm:$0xff] }
 0x1f7   : > { %1829 = vmatmul.mubr.msk.bf16.gmra.mrb[12].mxu0 %vm607_vm2, %v600_v63  ;;  %v742_v63 = vld [vmem:[#allocation3 + $0x68] sm:$0xff] }
 0x2b2   : > { %v2732_v0 = vpop.f32.mrb[0].mxu0 }
 0x2b3   : > { %749 = vmax.xlane.f32.xlu1 %v2732_v0  ;;  %v2735_v1 = vpop.f32.mrb[1].mxu0 }
 0x2b4   : > { %745 = vmax.xlane.f32.xlu0 %v2735_v1  ;;  %v2738_v2 = vpop.f32.mrb[2].mxu0 }
 0x2b5   : > { %v2740_v3 = vpop.f32.mrb[3].mxu0 }
 0x2b7   : > { %751 = vmax.xlane.f32.xlu1 %v2738_v2 }
 0x2b8   : > { %747 = vmax.xlane.f32.xlu0 %v2740_v3 }
 0x2ba   : > { %v2744_v4 = vpop.f32.mrb[4].mxu0 }
 0x2bb   : > { %v2746_v5 = vpop.f32.mrb[5].mxu0 }
 0x2bc   : > { %753 = vmax.xlane.f32.xlu0 %v2746_v5  ;;  %v2749_v6 = vpop.f32.mrb[6].mxu0 }
 0x2bd   : > { %759 = vmax.xlane.f32.xlu1 %v2749_v6  ;;  %v2752_v7 = vpop.f32.mrb[7].mxu0 }
 0x2c0   : > { %757 = vmax.xlane.f32.xlu0 %v2744_v4 }
 0x2c1   : > { %755 = vmax.xlane.f32.xlu1 %v2752_v7 }
 0x2c2   : > { %v2756_v8 = vpop.f32.mrb[8].mxu0 }
 0x2c3   : > { %v2758_v10 = vpop.f32.mrb[9].mxu0 }
 0x2c4   : > { %v2760_v11 = vpop.f32.mrb[10].mxu0  ;;  %761 = vmax.xlane.f32.xlu0 %v2758_v10 }
 0x2c5   : > { %767 = vmax.xlane.f32.xlu1 %v2760_v11  ;;  %v2764_v12 = vpop.f32.mrb[11].mxu0 }
 0x2c8   : > { %765 = vmax.xlane.f32.xlu0 %v2756_v8 }
 0x2c9   : > { %763 = vmax.xlane.f32.xlu1 %v2764_v12 }
 0x2ca   : > { %v2768_v13 = vpop.f32.mrb[12].mxu0 }
 0x2cb   : > { %v2770_v14 = vpop.f32.mrb[13].mxu0 }
 0x2cc   : > { %v2772_v15 = vpop.f32.mrb[14].mxu0  ;;  %769 = vmax.xlane.f32.xlu0 %v2770_v14 }
 0x2cd   : > { %775 = vmax.xlane.f32.xlu1 %v2772_v15  ;;  %v2776_v16 = vpop.f32.mrb[15].mxu0 }
 0x2d0   : > { %773 = vmax.xlane.f32.xlu0 %v2768_v13 }
 0x2d1   : > { %771 = vmax.xlane.f32.xlu1 %v2776_v16 }
 0x340   : > { %v750_v19 = vpop.xlane.xlu1 %749 }
 0x341   : > { %v2783_v20 = vmax.f32 %v2780_v17, %v750_v19  ;;  %v746_v21 = vpop.xlane.xlu0 %745 }
 0x342   : > { %v777_v22 = vmax.f32 %v729_v18, %v746_v21 }
 0x343   : > { %1317 = vst.msk [vmem:[#allocation3 + $0x10] sm:$0xff] %vm1049_vm3, %v2783_v20  ;;  %853 = vperm.xlu1 %2012, %v2783_v20  }
 0x344   : > { %1315 = vst.msk [vmem:[#allocation3] sm:$0xff] %vm1049_vm3, %v777_v22  ;;  %v752_v25 = vpop.xlane.xlu1 %751  ;;  %843 = vperm.xlu0 %2011, %v777_v22   ;;  %v793_v50 = vsub.f32 %v729_v18, %v777_v22 }
 0x345   : > { %v780_v26 = vmax.f32 %v2785_v23, %v752_v25  ;;  %v748_v27 = vpop.xlane.xlu0 %747 }
 0x346   : > { %v2795_v28 = vmax.f32 %v2790_v24, %v748_v27  ;;  %v809_v57 = vmul.f32 1.442695, %v793_v50  ;;  %v795_v27 = vsub.f32 %v2780_v17, %v2783_v20 }
 0x347   : > { %1318 = vst.msk [vmem:[#allocation3 + $0x18] sm:$0xff] %vm1049_vm3, %v780_v26  ;;  %858 = vperm.xlu1 %2012, %v780_v26   ;;  %v796_v58 = vsub.f32 %v2785_v23, %v780_v26 }
 0x348   : > { %1316 = vst.msk [vmem:[#allocation3 + $0x8] sm:$0xff] %vm1049_vm3, %v2795_v28  ;;  %v794_v9 = vsub.f32 %v2790_v24, %v2795_v28  ;;  %2014 = vpow2.f32 %v809_v57 }
 0x349   : > { %v754_v31 = vpop.xlane.xlu0 %753  ;;  %v815_v21 = vmul.f32 1.442695, %v796_v58 }
 0x34a   : > { %v2805_v32 = vmax.f32 %v2798_v29, %v754_v31  ;;  %v760_v33 = vpop.xlane.xlu1 %759 }
 0x34b   : > { %v2808_v34 = vmax.f32 %v2802_v30, %v760_v33  ;;  %848 = vperm.xlu1 %2012, %v2795_v28   ;;  %v811_v28 = vmul.f32 1.442695, %v794_v9  ;;  %2016 = vpow2.f32 %v815_v21 }
 0x34c   : > { %1319 = vst.msk [vmem:[#allocation3 + $0x20] sm:$0xff] %vm1049_vm3, %v2805_v32 }
 0x34d   : > { %1322 = vst.msk [vmem:[#allocation3 + $0x38] sm:$0xff] %vm1049_vm3, %v2808_v34  ;;  %v758_v37 = vpop.xlane.xlu0 %757  ;;  %v800_v31 = vsub.f32 %v2802_v30, %v2808_v34  ;;  %2018 = vpow2.f32 %v811_v28 }
 0x34e   : > { %v2818_v38 = vmax.f32 %v2811_v35, %v758_v37  ;;  %v756_v39 = vpop.xlane.xlu1 %755  ;;  %v797_v37 = vsub.f32 %v2798_v29, %v2805_v32 }
 0x34f   : > { %v782_v40 = vmax.f32 %v734_v36, %v756_v39  ;;  %v823_v39 = vmul.f32 1.442695, %v800_v31 }
 0x350   : > { %1321 = vst.msk [vmem:[#allocation3 + $0x30] sm:$0xff] %vm1049_vm3, %v2818_v38  ;;  %873 = vperm.xlu1 %2012, %v2818_v38   ;;  %v817_v30 = vmul.f32 1.442695, %v797_v37 }
 0x351   : > { %1320 = vst.msk [vmem:[#allocation3 + $0x28] sm:$0xff] %vm1049_vm3, %v782_v40  ;;  %v762_v43 = vpop.xlane.xlu0 %761  ;;  %v798_v22 = vsub.f32 %v734_v36, %v782_v40  ;;  %v813_v36 = vmul.f32 1.442695, %v795_v27 }
 0x352   : > { %v768_v44 = vpop.xlane.xlu1 %767  ;;  %v2829_v45 = vmax.f32 %v2820_v41, %v762_v43  ;;  %v2892_v20 = vpop.eup %2014 }
 0x353   : > { %v2832_v46 = vmax.f32 %v2825_v42, %v768_v44  ;;  %v819_v33 = vmul.f32 1.442695, %v798_v22 }
 0x354   : > { %1323 = vst.msk [vmem:[#allocation3 + $0x40] sm:$0xff] %vm1049_vm3, %v2829_v45  ;;  %863 = vperm.xlu1 %2012, %v2805_v32  }
 0x355   : > { %1326 = vst.msk [vmem:[#allocation3 + $0x58] sm:$0xff] %vm1049_vm3, %v2832_v46  ;;  %v766_v49 = vpop.xlane.xlu0 %765  ;;  %2020 = vpow2.f32 %v819_v33  ;;  %v804_v17 = vsub.f32 %v2825_v42, %v2832_v46 }
 0x356   : > { %v764_v51 = vpop.xlane.xlu1 %763  ;;  %v2844_v52 = vmax.f32 %v2834_v47, %v766_v49  ;;  %2022 = vpow2.f32 %v813_v36 }
 0x357   : > { %v786_v53 = vmax.f32 %v2839_v48, %v764_v51  ;;  %2024 = vpow2.f32 %v823_v39  ;;  %v831_v29 = vmul.f32 1.442695, %v804_v17 }
 0x358   : > { %1325 = vst.msk [vmem:[#allocation3 + $0x50] sm:$0xff] %vm1049_vm3, %v2844_v52  ;;  %868 = vperm.xlu1 %2012, %v782_v40   ;;  %v2899_v40 = vpop.eup %2016  ;;  %2026 = vpow2.f32 %v817_v30  ;;  %v803_v43 = vsub.f32 %v2834_v47, %v2844_v52 }
 0x359   : > { %1324 = vst.msk [vmem:[#allocation3 + $0x48] sm:$0xff] %vm1049_vm3, %v786_v53  ;;  %888 = vperm.xlu0 %2011, %v786_v53   ;;  %v770_v56 = vpop.xlane.xlu0 %769  ;;  %v802_v32 = vsub.f32 %v2839_v48, %v786_v53  ;;  %2028 = vpow2.f32 %v831_v29  ;;  %v801_v48 = vsub.f32 %v2820_v41, %v2829_v45 }
 0x35a   : > { %v776_v59 = vpop.xlane.xlu1 %775  ;;  %v2856_v60 = vmax.f32 %v2847_v54, %v770_v56  ;;  %v829_v49 = vmul.f32 1.442695, %v803_v43 }
 0x35b   : > { %v2859_v61 = vmax.f32 %v2851_v55, %v776_v59  ;;  %v827_v44 = vmul.f32 1.442695, %v802_v32 }
 0x35c   : > { %1327 = vst.msk [vmem:[#allocation3 + $0x60] sm:$0xff] %vm1049_vm3, %v2856_v60  ;;  %878 = vperm.xlu1 %2012, %v2808_v34   ;;  %v799_v34 = vsub.f32 %v2811_v35, %v2818_v38  ;;  %v2905_v38 = vpop.eup %2018  ;;  %v805_v53 = vsub.f32 %v2847_v54, %v2856_v60 }
 0x35d   : > { %v808_v18 = vsub.f32 %v2851_v55, %v2859_v61  ;;  %1330 = vst.msk [vmem:[#allocation3 + $0x78] sm:$0xff] %vm1049_vm3, %v2859_v61  ;;  %898 = vperm.xlu0 %2011, %v2832_v46   ;;  %v774_v19 = vpop.xlane.xlu0 %773 }
 0x35e   : > { %v772_v23 = vpop.xlane.xlu1 %771  ;;  %v2874_v25 = vmax.f32 %v2861_v62, %v774_v19  ;;  %v821_v42 = vmul.f32 1.442695, %v799_v34  ;;  %v833_v56 = vmul.f32 1.442695, %v805_v53 }
 0x35f   : > { %v790_v26 = vmax.f32 %v742_v63, %v772_v23  ;;  %v2907_v46 = vpop.eup %2020 }
 0x360   : > { %v807_v24 = vsub.f32 %v2861_v62, %v2874_v25  ;;  %1329 = vst.msk [vmem:[#allocation3 + $0x70] sm:$0xff] %vm1049_vm3, %v2874_v25  ;;  %883 = vperm.xlu1 %2012, %v2829_v45   ;;  %2030 = vpow2.f32 %v821_v42  ;;  %v2913_v50 = vpop.eup %2022 }
 0x361   : > { %1328 = vst.msk [vmem:[#allocation3 + $0x68] sm:$0xff] %vm1049_vm3, %v790_v26  ;;  %908 = vperm.xlu0 %2011, %v790_v26   ;;  %v806_v35 = vsub.f32 %v742_v63, %v790_v26  ;;  %2032 = vpow2.f32 %v827_v44  ;;  %v2915_v51 = vpop.eup %2024 }
 0x362   : > { %2034 = vpow2.f32 %v829_v49  ;;  %v2921_v41 = vpop.eup %2026 }
 0x363   : > { %v835_v47 = vmul.f32 1.442695, %v806_v35  ;;  %v2923_v45 = vpop.eup %2028 }
 0x364   : > { %893 = vperm.xlu1 %2012, %v2844_v52   ;;  %v825_v52 = vmul.f32 1.442695, %v801_v48 }
 0x365   : > { %918 = vperm.xlu0 %2011, %v2859_v61   ;;  %2036 = vpow2.f32 %v835_v47 }
 0x366   : > { %2038 = vpow2.f32 %v825_v52 }
 0x367   : > { %2040 = vpow2.f32 %v833_v56 }
 0x368   : > { %903 = vperm.xlu1 %2012, %v2856_v60  }
 0x369   : > { %1189 = vperm.xlu0 %2011, %v2892_v20  }
 0x36a   : > { %v2927_v57 = vpop.eup %2030 }
 0x36b   : > { %v2929_v58 = vpop.eup %2032 }
 0x36c   : > { %913 = vperm.xlu1 %2012, %v2874_v25   ;;  %v2933_v54 = vpop.eup %2034 }
 0x36d   : > { %1204 = vperm.xlu0 %2011, %v2899_v40  }
 0x36f   : > { %v2935_v59 = vpop.eup %2036 }
 0x370   : > { %1194 = vperm.xlu1 %2012, %v2905_v38   ;;  %v2939_v60 = vpop.eup %2038 }
 0x371   : > { %1214 = vperm.xlu0 %2011, %v2907_v46   ;;  %v2942_v63 = vpop.eup %2040 }
 0x374   : > { %1199 = vperm.xlu1 %2012, %v2913_v50  }
 0x375   : > { %1224 = vperm.xlu0 %2011, %v2915_v51  }
 0x378   : > { %1209 = vperm.xlu1 %2012, %v2921_v41  }
 0x379   : > { %1244 = vperm.xlu0 %2011, %v2923_v45  }
 0x37c   : > { %1219 = vperm.xlu1 %2012, %v2927_v57  }
 0x37d   : > { %1234 = vperm.xlu0 %2011, %v2929_v58  }
 0x380   : > { %1239 = vperm.xlu1 %2012, %v2933_v54  }
 0x381   : > { %1254 = vperm.xlu0 %2011, %v2935_v59  }
 0x384   : > { %1229 = vperm.xlu1 %2012, %v2939_v60  }
 0x388   : > { %1249 = vperm.xlu1 %2012, %v2942_v63  }
 0x3c2   : > { %v854_v9 = vpop.permute.xlu1 %853 }
 0x3c3   : > { %v923_v19 = vsub.f32 %v2732_v0, %v854_v9  ;;  %v844_v21 = vpop.permute.xlu0 %843 }
 0x3c4   : > { %v921_v22 = vsub.f32 %v2735_v1, %v844_v21 }
 0x3c5   : > { %v941_v23 = vmul.f32 1.442695, %v923_v19 }
 0x3c6   : > { %v937_v26 = vmul.f32 1.442695, %v921_v22  ;;  %v859_v27 = vpop.permute.xlu1 %858 }
 0x3c7   : > { %2042 = vpow2.f32 %v941_v23  ;;  %v924_v28 = vsub.f32 %v2738_v2, %v859_v27 }
 0x3c8   : > { %2044 = vpow2.f32 %v937_v26 }
 0x3c9   : > { %v943_v31 = vmul.f32 1.442695, %v924_v28 }
 0x3ca   : > { %v849_v33 = vpop.permute.xlu1 %848 }
 0x3cb   : > { %2046 = vpow2.f32 %v943_v31  ;;  %v922_v36 = vsub.f32 %v2740_v3, %v849_v33 }
 0x3cd   : > { %v939_v37 = vmul.f32 1.442695, %v922_v36 }
 0x3cf   : > { %2048 = vpow2.f32 %v939_v37  ;;  %v874_v39 = vpop.permute.xlu1 %873 }
 0x3d0   : > { %v927_v0 = vsub.f32 %v2744_v4, %v874_v39 }
 0x3d1   : > { %v2043_v17 = vpop.eup %2042 }
 0x3d2   : > { %v2045_v30 = vpop.eup %2044  ;;  %v949_v1 = vmul.f32 1.442695, %v927_v0  ;;  %1005 = vadd.xlane.f32.xlu0 %v2043_v17 }
 0x3d3   : > { %1001 = vadd.xlane.f32.xlu1 %v2045_v30  ;;  %v864_v34 = vpop.permute.xlu1 %863 }
 0x3d4   : > { %2050 = vpow2.f32 %v949_v1  ;;  %v925_v2 = vsub.f32 %v2746_v5, %v864_v34 }
 0x3d5   : > { %v2047_v29 = vpop.eup %2046 }
 0x3d6   : > { %v945_v32 = vmul.f32 1.442695, %v925_v2  ;;  %v1067_v42 = vpack.c.bf16 %v2047_v29, %v2043_v17 }
 0x3d7   : > { %1007 = vadd.xlane.f32.xlu1 %v2047_v29  ;;  %v869_v43 = vpop.permute.xlu1 %868 }
 0x3d8   : > { %2052 = vpow2.f32 %v945_v32  ;;  %v926_v3 = vsub.f32 %v2752_v7, %v869_v43  ;;  %v889_v44 = vpop.permute.xlu0 %888 }
 0x3d9   : > { %v2049_v35 = vpop.eup %2048  ;;  %v930_v49 = vsub.f32 %v2764_v12, %v889_v44 }
 0x3da   : > { %v947_v4 = vmul.f32 1.442695, %v926_v3  ;;  %1003 = vadd.xlane.f32.xlu0 %v2049_v35  ;;  %v1066_v48 = vpack.c.bf16 %v2049_v35, %v2045_v30 }
 0x3db   : > { %v879_v47 = vpop.permute.xlu1 %878  ;;  %v955_v9 = vmul.f32 1.442695, %v930_v49  ;;  %v837_v49 = vmul.f32 1.442695, %v807_v24 }
 0x3dc   : > { %2054 = vpow2.f32 %v947_v4  ;;  %v928_v52 = vsub.f32 %v2749_v6, %v879_v47  ;;  %v899_v5 = vpop.permute.xlu0 %898  ;;  %1834 = vmatprep.mubr.bf16.mxu1 %v1066_v48  ;;  %v839_v47 = vmul.f32 1.442695, %v808_v18 }
 0x3dd   : > { %1835 = vmatmul.mubr.bf16.vlgmr.msra.gmra.mrb[0].mxu1 %v1067_v42  ;;  %v932_v19 = vsub.f32 %v2760_v11, %v899_v5 }
 0x3de   : > { %v2051_v53 = vpop.eup %2050  ;;  %v951_v56 = vmul.f32 1.442695, %v928_v52 }
 0x3df   : > { %1013 = vadd.xlane.f32.xlu0 %v2051_v53  ;;  %v884_v7 = vpop.permute.xlu1 %883  ;;  %v959_v26 = vmul.f32 1.442695, %v932_v19 }
 0x3e0   : > { %2056 = vpow2.f32 %v951_v56  ;;  %v929_v21 = vsub.f32 %v2758_v10, %v884_v7  ;;  %v909_v22 = vpop.permute.xlu0 %908 }
 0x3e1   : > { %2058 = vpow2.f32 %v955_v9  ;;  %v934_v6 = vsub.f32 %v2776_v16, %v909_v22 }
 0x3e2   : > { %v2053_v23 = vpop.eup %2052  ;;  %v953_v12 = vmul.f32 1.442695, %v929_v21 }
 0x3e3   : > { %1009 = vadd.xlane.f32.xlu0 %v2053_v23  ;;  %v894_v27 = vpop.permute.xlu1 %893  ;;  %v963_v36 = vmul.f32 1.442695, %v934_v6 }
 0x3e4   : > { %2060 = vpow2.f32 %v953_v12  ;;  %v931_v28 = vsub.f32 %v2756_v8, %v894_v27  ;;  %v919_v31 = vpop.permute.xlu0 %918 }
 0x3e5   : > { %2062 = vpow2.f32 %v959_v26  ;;  %v936_v37 = vsub.f32 %v2772_v15, %v919_v31  ;;  %v969_v26 = vld [vmem:[#allocation4] sm:$0xff] }
 0x3e6   : > { %v2055_v33 = vpop.eup %2054  ;;  %v957_v11 = vmul.f32 1.442695, %v931_v28  ;;  %v985_v28 = vmul.f32 %v2892_v20, %v969_v26  ;;  %v975_v20 = vld [vmem:[#allocation4 + $0x30] sm:$0xff] }
 0x3e7   : > { %v904_v10 = vpop.permute.xlu1 %903  ;;  %v1068_v39 = vpack.c.bf16 %v2055_v33, %v2053_v23  ;;  %v967_v30 = vmul.f32 1.442695, %v936_v37  ;;  %v971_v23 = vld [vmem:[#allocation4 + $0x10] sm:$0xff] }
 0x3e8   : > { %2064 = vpow2.f32 %v957_v11  ;;  %v933_v0 = vsub.f32 %v2770_v14, %v904_v10  ;;  %v987_v6 = vmul.f32 %v2913_v50, %v971_v23  ;;  %v972_v11 = vld [vmem:[#allocation4 + $0x18] sm:$0xff]  ;;  %v970_v10 = vld [vmem:[#allocation4 + $0x8] sm:$0xff] }
 0x3e9   : > { %1838 = vmatprep.mubr.bf16.mxu1 %v1068_v39  ;;  %2066 = vpow2.f32 %v963_v36  ;;  %v988_v37 = vmul.f32 %v2899_v40, %v972_v11 }
 0x3ea   : > { %v2057_v17 = vpop.eup %2056  ;;  %v961_v16 = vmul.f32 1.442695, %v933_v0 }
 0x3eb   : > { %1015 = vadd.xlane.f32.xlu1 %v2057_v17  ;;  %v914_v1 = vpop.permute.xlu1 %913  ;;  %v1069_v8 = vpack.c.bf16 %v2057_v17, %v2051_v53  ;;  %v2059_v2 = vpop.eup %2058  ;;  %v986_v17 = vmul.f32 %v2905_v38, %v970_v10  ;;  %v976_v38 = vld [vmem:[#allocation4 + $0x38] sm:$0xff]  ;;  %v981_v10 = vld [vmem:[#allocation4 + $0x60] sm:$0xff] }
 0x3ec   : > { %2068 = vpow2.f32 %v961_v16  ;;  %v935_v34 = vsub.f32 %v2768_v13, %v914_v1  ;;  %v2973_v53 = vpop.permute.xlu0 %1189 }
 0x3ed   : > { %1839 = vmatmul.mubr.bf16.gmra.mrb[4].mxu1 %v1069_v8  ;;  %2070 = vpow2.f32 %v967_v30  ;;  %v991_v30 = vmul.f32 %v2927_v57, %v975_v20  ;;  %v973_v8 = vld [vmem:[#allocation4 + $0x20] sm:$0xff] }
 0x3ee   : > { %v2061_v29 = vpop.eup %2060  ;;  %v965_v15 = vmul.f32 1.442695, %v935_v34  ;;  %v989_v40 = vmul.f32 %v2921_v41, %v973_v8  ;;  %v1172_v8 = vld [vmem:[#allocation5 + $0x8] sm:$0xff] }
 0x3ef   : > { %1011 = vadd.xlane.f32.xlu1 %v2055_v33  ;;  %v1070_v32 = vpack.c.bf16 %v2059_v2, %v2061_v29  ;;  %v2063_v14 = vpop.eup %2062  ;;  %v2975_v56 = vpop.permute.xlu1 %1194 }
 0x3f0   : > { %2072 = vpow2.f32 %v965_v15  ;;  %v2977_v62 = vpop.permute.xlu0 %1204  ;;  %v992_v15 = vmul.f32 %v2915_v51, %v976_v38  ;;  %v977_v51 = vld [vmem:[#allocation4 + $0x40] sm:$0xff]  ;;  %v1268_v38 = vmul.f32 %v2975_v56, %v1172_v8 }
 0x3f1   : > { %1842 = vmatprep.mubr.bf16.mxu1 %v1070_v32  ;;  %2074 = vpow2.f32 %v837_v49  ;;  %v978_v49 = vld [vmem:[#allocation4 + $0x48] sm:$0xff] }
 0x3f2   : > { %v2065_v42 = vpop.eup %2064  ;;  %2076 = vpow2.f32 %v839_v47  ;;  %v994_v26 = vmul.f32 %v2929_v58, %v978_v49 }
 0x3f3   : > { %1023 = vadd.xlane.f32.xlu1 %v2063_v14  ;;  %1021 = vadd.xlane.f32.xlu0 %v2065_v42  ;;  %v1071_v43 = vpack.c.bf16 %v2063_v14, %v2065_v42  ;;  %v2067_v3 = vpop.eup %2066  ;;  %v2979_v25 = vpop.permute.xlu1 %1199  ;;  %v974_v14 = vld [vmem:[#allocation4 + $0x28] sm:$0xff] }
 0x3f4   : > { %v2981_v24 = vpop.permute.xlu0 %1214  ;;  %v990_v57 = vmul.f32 %v2907_v46, %v974_v14  ;;  %v993_v46 = vmul.f32 %v2939_v60, %v977_v51  ;;  %v982_v60 = vld [vmem:[#allocation4 + $0x68] sm:$0xff] }
 0x3f5   : > { %1843 = vmatmul.mubr.bf16.gmra.mrb[8].mxu1 %v1071_v43 }
 0x3f6   : > { %v2069_v44 = vpop.eup %2068 }
 0x3f7   : > { %1019 = vadd.xlane.f32.xlu1 %v2059_v2  ;;  %1017 = vadd.xlane.f32.xlu0 %v2061_v29  ;;  %v1072_v13 = vpack.c.bf16 %v2067_v3, %v2069_v44  ;;  %v2071_v35 = vpop.eup %2070  ;;  %v2983_v55 = vpop.permute.xlu1 %1209 }
 0x3f8   : > { %v2985_v61 = vpop.permute.xlu0 %1224 }
 0x3f9   : > { %1846 = vmatprep.mubr.bf16.mxu1 %v1072_v13 }
 0x3fa   : > { %v2073_v4 = vpop.eup %2072 }
 0x3fb   : > { %1031 = vadd.xlane.f32.xlu1 %v2071_v35  ;;  %1029 = vadd.xlane.f32.xlu0 %v2073_v4  ;;  %v1073_v48 = vpack.c.bf16 %v2071_v35, %v2073_v4  ;;  %v2967_v52 = vpop.eup %2074  ;;  %v2987_v18 = vpop.permute.xlu1 %1219 }
 0x3fc   : > { %v2970_v5 = vpop.eup %2076  ;;  %v2989_v9 = vpop.permute.xlu0 %1244 }
 0x3fd   : > { %1847 = vmatmul.mubr.bf16.gmra.mrb[12].mxu1 %v1073_v48 }
 0x3ff   : > { %1027 = vadd.xlane.f32.xlu1 %v2067_v3  ;;  %1025 = vadd.xlane.f32.xlu0 %v2069_v44  ;;  %v2991_v19 = vpop.permute.xlu1 %1239  ;;  %v979_v3 = vld [vmem:[#allocation4 + $0x50] sm:$0xff]  ;;  %v980_v44 = vld [vmem:[#allocation4 + $0x58] sm:$0xff] }
 0x400   : > { %v2993_v7 = vpop.permute.xlu0 %1234  ;;  %v995_v41 = vmul.f32 %v2933_v54, %v979_v3  ;;  %v996_v35 = vmul.f32 %v2923_v45, %v980_v44  ;;  %v984_v54 = vld [vmem:[#allocation4 + $0x78] sm:$0xff] }
 0x401   : > { %v1000_v11 = vmul.f32 %v2970_v5, %v984_v54 }
 0x403   : > { %v2995_v21 = vpop.permute.xlu1 %1229 }
 0x404   : > { %v2997_v22 = vpop.permute.xlu0 %1254 }
 0x407   : > { %v2999_v12 = vpop.permute.xlu1 %1249 }
 0x410   : > { %1259 = vperm.xlu1 %2012, %v2967_v52  }
 0x415   : > { %1264 = vperm.xlu0 %2011, %v2970_v5   ;;  %v1173_v5 = vld [vmem:[#allocation5 + $0x10] sm:$0xff] }
 0x45f   : > { %v1006_v27 = vpop.xlane.xlu0 %1005 }
 0x460   : > { %v1035_v31 = vadd.f32 %v1006_v27, %v987_v6  ;;  %v1002_v33 = vpop.xlane.xlu1 %1001 }
 0x461   : > { %v1033_v36 = vadd.f32 %v1002_v33, %v985_v28  ;;  %v983_v28 = vld [vmem:[#allocation4 + $0x70] sm:$0xff] }
 0x462   : > { %1052 = vst.msk [vmem:[#allocation4 + $0x10] sm:$0xff] %vm1049_vm3, %v1035_v31  ;;  %v999_v33 = vmul.f32 %v2967_v52, %v983_v28 }
 0x463   : > { %1050 = vst.msk [vmem:[#allocation4] sm:$0xff] %vm1049_vm3, %v1033_v36 }
 0x464   : > { %v1008_v39 = vpop.xlane.xlu1 %1007 }
 0x465   : > { %v1036_v0 = vadd.f32 %v1008_v39, %v988_v37 }
 0x467   : > { %1053 = vst.msk [vmem:[#allocation4 + $0x18] sm:$0xff] %vm1049_vm3, %v1036_v0  ;;  %v1004_v50 = vpop.xlane.xlu0 %1003  ;;  %v997_v0 = vmul.f32 %v2942_v63, %v981_v10 }
 0x468   : > { %v1034_v16 = vadd.f32 %v1004_v50, %v986_v17  ;;  %v998_v17 = vmul.f32 %v2935_v59, %v982_v60  ;;  %v1183_v60 = vld [vmem:[#allocation5 + $0x60] sm:$0xff] }
 0x46a   : > { %1051 = vst.msk [vmem:[#allocation4 + $0x8] sm:$0xff] %vm1049_vm3, %v1034_v16 }
 0x46c   : > { %v1014_v1 = vpop.xlane.xlu0 %1013 }
 0x46d   : > { %v1039_v34 = vadd.f32 %v1014_v1, %v991_v30  ;;  %v1171_v30 = vld [vmem:[#allocation5] sm:$0xff]  ;;  %v1174_v1 = vld [vmem:[#allocation5 + $0x18] sm:$0xff] }
 0x46e   : > { %v1270_v63 = vmul.f32 %v2977_v62, %v1174_v1  ;;  %v1178_v62 = vld [vmem:[#allocation5 + $0x38] sm:$0xff] }
 0x46f   : > { %1056 = vst.msk [vmem:[#allocation4 + $0x30] sm:$0xff] %vm1049_vm3, %v1039_v34  ;;  %v1269_v34 = vmul.f32 %v2979_v25, %v1173_v5  ;;  %v1175_v25 = vld [vmem:[#allocation5 + $0x20] sm:$0xff] }
 0x470   : > { %v1010_v2 = vpop.xlane.xlu0 %1009  ;;  %v1271_v56 = vmul.f32 %v2983_v55, %v1175_v25  ;;  %v1182_v55 = vld [vmem:[#allocation5 + $0x58] sm:$0xff] }
 0x471   : > { %v1037_v29 = vadd.f32 %v1010_v2, %v989_v40  ;;  %v1267_v40 = vmul.f32 %v2973_v53, %v1171_v30  ;;  %v1177_v53 = vld [vmem:[#allocation5 + $0x30] sm:$0xff] }
 0x472   : > { %v1273_v3 = vmul.f32 %v2987_v18, %v1177_v53  ;;  %v1179_v18 = vld [vmem:[#allocation5 + $0x40] sm:$0xff] }
 0x473   : > { %1054 = vst.msk [vmem:[#allocation4 + $0x20] sm:$0xff] %vm1049_vm3, %v1037_v29 }
 0x478   : > { %v1016_v32 = vpop.xlane.xlu1 %1015 }
 0x479   : > { %v1040_v42 = vadd.f32 %v1016_v32, %v992_v15 }
 0x47b   : > { %1057 = vst.msk [vmem:[#allocation4 + $0x38] sm:$0xff] %vm1049_vm3, %v1040_v42 }
 0x47c   : > { %v1012_v43 = vpop.xlane.xlu1 %1011 }
 0x47d   : > { %v1038_v13 = vadd.f32 %v1012_v43, %v990_v57  ;;  %v1176_v43 = vld [vmem:[#allocation5 + $0x28] sm:$0xff] }
 0x47f   : > { %1055 = vst.msk [vmem:[#allocation4 + $0x28] sm:$0xff] %vm1049_vm3, %v1038_v13  ;;  %v1274_v13 = vmul.f32 %v2985_v61, %v1178_v62  ;;  %v1180_v61 = vld [vmem:[#allocation5 + $0x48] sm:$0xff] }
 0x480   : > { %v1022_v4 = vpop.xlane.xlu0 %1021  ;;  %v1024_v48 = vpop.xlane.xlu1 %1023 }
 0x481   : > { %v1043_v47 = vadd.f32 %v1022_v4, %v995_v41  ;;  %v1044_v23 = vadd.f32 %v1024_v48, %v996_v35  ;;  %v1272_v4 = vmul.f32 %v2981_v24, %v1176_v43  ;;  %v1275_v24 = vmul.f32 %v2995_v21, %v1179_v18  ;;  %v1186_v21 = vld [vmem:[#allocation5 + $0x78] sm:$0xff] }
 0x483   : > { %1060 = vst.msk [vmem:[#allocation4 + $0x50] sm:$0xff] %vm1049_vm3, %v1043_v47  ;;  %1061 = vst.msk [vmem:[#allocation4 + $0x58] sm:$0xff] %vm1049_vm3, %v1044_v23  ;;  %v1181_v23 = vld [vmem:[#allocation5 + $0x50] sm:$0xff] }
 0x484   : > { %v1018_v6 = vpop.xlane.xlu0 %1017  ;;  %v1020_v27 = vpop.xlane.xlu1 %1019 }
 0x485   : > { %v1041_v31 = vadd.f32 %v1018_v6, %v993_v46  ;;  %v1042_v45 = vadd.f32 %v1020_v27, %v994_v26  ;;  %v1277_v26 = vmul.f32 %v2991_v19, %v1181_v23  ;;  %v1278_v27 = vmul.f32 %v2989_v9, %v1182_v55 }
 0x487   : > { %1058 = vst.msk [vmem:[#allocation4 + $0x40] sm:$0xff] %vm1049_vm3, %v1041_v31  ;;  %1059 = vst.msk [vmem:[#allocation4 + $0x48] sm:$0xff] %vm1049_vm3, %v1042_v45  ;;  %v1276_v31 = vmul.f32 %v2993_v7, %v1180_v61 }
 0x488   : > { %v1030_v36 = vpop.xlane.xlu0 %1029  ;;  %v1032_v37 = vpop.xlane.xlu1 %1031 }
 0x489   : > { %v1047_v39 = vadd.f32 %v1030_v36, %v999_v33  ;;  %v1048_v58 = vadd.f32 %v1032_v37, %v1000_v11  ;;  %v1185_v37 = vld [vmem:[#allocation5 + $0x70] sm:$0xff] }
 0x48a   : > { %v1362_v25 = vld [vmem:[#allocation4 + $0x58] sm:$0xff] (!%p1752_p9)  ;;  %v1361_v43 = vld [vmem:[#allocation4 + $0x50] sm:$0xff] (!%p1752_p9) }
 0x48b   : > { %1064 = vst.msk [vmem:[#allocation4 + $0x70] sm:$0xff] %vm1049_vm3, %v1047_v39  ;;  %1065 = vst.msk [vmem:[#allocation4 + $0x78] sm:$0xff] %vm1049_vm3, %v1048_v58  ;;  %v1184_v39 = vld [vmem:[#allocation5 + $0x68] sm:$0xff]  ;;  %v1279_v58 = vmul.f32 %v2999_v12, %v1183_v60  ;;  %v1353_v12 = vld [vmem:[#allocation4 + $0x10] sm:$0xff] (!%p1752_p9) }
 0x48c   : > { %v1026_v50 = vpop.xlane.xlu0 %1025  ;;  %v1028_v16 = vpop.xlane.xlu1 %1027  ;;  %2081 = vrcp.f32 (!%p1752_p9), %v1353_v12 }
 0x48d   : > { %v1045_v20 = vadd.f32 %v1026_v50, %v997_v0  ;;  %v1046_v52 = vadd.f32 %v1028_v16, %v998_v17 }
 0x48f   : > { %1062 = vst.msk [vmem:[#allocation4 + $0x60] sm:$0xff] %vm1049_vm3, %v1045_v20  ;;  %1063 = vst.msk [vmem:[#allocation4 + $0x68] sm:$0xff] %vm1049_vm3, %v1046_v52  ;;  %v1280_v20 = vmul.f32 %v2997_v22, %v1184_v39  ;;  %v2327_v22 = vmov (!%p1752_p9), 0  }
 0x490   : > { %v1260_v10 = vpop.permute.xlu1 %1259  ;;  %2079 = vset.pattern.permute.xlu1 (!%p1752_p9), %v2327_v22  ;;  %2078 = vset.pattern.permute.xlu0 (!%p1752_p9), %v2327_v22 }
 0x491   : > { %v1281_v7 = vmul.f32 %v1260_v10, %v1185_v37 }
 0x494   : > { %v1265_v9 = vpop.permute.xlu0 %1264 }
 0x495   : > { %v1282_v17 = vmul.f32 %v1265_v9, %v1186_v21 }
 0x4b0   : > { %v1836_v2 = vpop.f32.mrb[0].mxu1 }
 0x4b1   : > { %v1285_v59 = vadd.f32 %v1836_v2, %v1269_v34  ;;  %v1108_v29 = vpop.f32.mrb[1].mxu1  ;;  %v1351_v34 = vld [vmem:[#allocation4] sm:$0xff] (!%p1752_p9)  ;;  %v1352_v2 = vld [vmem:[#allocation4 + $0x8] sm:$0xff] (!%p1752_p9) }
 0x4b2   : > { %v1283_v15 = vadd.f32 %v1267_v40, %v1108_v29  ;;  %v1837_v32 = vpop.f32.mrb[2].mxu1  ;;  %v1354_v40 = vld [vmem:[#allocation4 + $0x18] sm:$0xff] (!%p1752_p9)  ;;  %2083 = vrcp.f32 (!%p1752_p9), %v1351_v34 }
 0x4b3   : > { %1301 = vst.msk [vmem:[#allocation5 + $0x10] sm:$0xff] %vm607_vm2, %v1285_v59  ;;  %v1286_v14 = vadd.f32 %v1837_v32, %v1270_v63  ;;  %v1111_v42 = vpop.f32.mrb[3].mxu1  ;;  %2085 = vrcp.f32 (!%p1752_p9), %v1354_v40  ;;  %v1356_v63 = vld [vmem:[#allocation4 + $0x28] sm:$0xff] (!%p1752_p9)  ;;  %v1355_v59 = vld [vmem:[#allocation4 + $0x20] sm:$0xff] (!%p1752_p9)  ;;  %v1358_v29 = vld [vmem:[#allocation4 + $0x38] sm:$0xff] (!%p1752_p9) }
 0x4b4   : > { %1299 = vst.msk [vmem:[#allocation5] sm:$0xff] %vm607_vm2, %v1283_v15  ;;  %v1284_v57 = vadd.f32 %v1268_v38, %v1111_v42  ;;  %2087 = vrcp.f32 (!%p1752_p9), %v1352_v2  ;;  %v1357_v38 = vld [vmem:[#allocation4 + $0x30] sm:$0xff] (!%p1752_p9)  ;;  %v2082_v15 = vpop.eup (!%p1752_p9), %2081 }
 0x4b5   : > { %1302 = vst.msk [vmem:[#allocation5 + $0x18] sm:$0xff] %vm607_vm2, %v1286_v14  ;;  %2089 = vrcp.f32 (!%p1752_p9), %v1356_v63  ;;  %1395 = vperm.xlu1 (!%p1752_p9), %2079, %v2082_v15   ;;  %v1360_v14 = vld [vmem:[#allocation4 + $0x48] sm:$0xff] (!%p1752_p9) }
 0x4b6   : > { %1300 = vst.msk [vmem:[#allocation5 + $0x8] sm:$0xff] %vm607_vm2, %v1284_v57  ;;  %2091 = vrcp.f32 (!%p1752_p9), %v1355_v59  ;;  %v1359_v57 = vld [vmem:[#allocation4 + $0x40] sm:$0xff] (!%p1752_p9) }
 0x4b7   : > { %2093 = vrcp.f32 (!%p1752_p9), %v1358_v29 }
 0x4b8   : > { %2095 = vrcp.f32 (!%p1752_p9), %v1357_v38 }
 0x4b9   : > { %2097 = vrcp.f32 (!%p1752_p9), %v1360_v14 }
 0x4ba   : > { %2099 = vrcp.f32 (!%p1752_p9), %v1359_v57 }
 0x4bb   : > { %2101 = vrcp.f32 (!%p1752_p9), %v1362_v25 }
 0x4bc   : > { %v2084_v32 = vpop.eup (!%p1752_p9), %2083  ;;  %2103 = vrcp.f32 (!%p1752_p9), %v1361_v43 }
 0x4bd   : > { %v2086_v42 = vpop.eup (!%p1752_p9), %2085  ;;  %1385 = vperm.xlu0 (!%p1752_p9), %2078, %v2084_v32  }
 0x4be   : > { %v2088_v53 = vpop.eup (!%p1752_p9), %2087  ;;  %1400 = vperm.xlu1 (!%p1752_p9), %2079, %v2086_v42  }
 0x4bf   : > { %v2090_v62 = vpop.eup (!%p1752_p9), %2089 }
 0x4c0   : > { %v1840_v44 = vpop.f32.mrb[4].mxu1 }
 0x4c1   : > { %v1289_v41 = vadd.f32 %v1840_v44, %v1273_v3  ;;  %v1124_v35 = vpop.f32.mrb[5].mxu1  ;;  %1390 = vperm.xlu0 (!%p1752_p9), %2078, %v2088_v53   ;;  %v2092_v3 = vpop.eup (!%p1752_p9), %2091 }
 0x4c2   : > { %v1287_v48 = vadd.f32 %v1271_v56, %v1124_v35  ;;  %v1841_v51 = vpop.f32.mrb[6].mxu1  ;;  %1410 = vperm.xlu1 (!%p1752_p9), %2079, %v2090_v62   ;;  %v1364_v56 = vld [vmem:[#allocation4 + $0x68] sm:$0xff] (!%p1752_p9)  ;;  %v2094_v44 = vpop.eup (!%p1752_p9), %2093 }
 0x4c3   : > { %1305 = vst.msk [vmem:[#allocation5 + $0x30] sm:$0xff] %vm607_vm2, %v1289_v41  ;;  %v1290_v49 = vadd.f32 %v1841_v51, %v1274_v13  ;;  %v1127_v47 = vpop.f32.mrb[7].mxu1  ;;  %v1363_v13 = vld [vmem:[#allocation4 + $0x60] sm:$0xff] (!%p1752_p9)  ;;  %v2328_v41 = vmov (!%p1752_p9), 0.0   ;;  %v2096_v35 = vpop.eup (!%p1752_p9), %2095  ;;  %2105 = vrcp.f32 (!%p1752_p9), %v1364_v56  ;;  %v1365_v51 = vld [vmem:[#allocation4 + $0x70] sm:$0xff] (!%p1752_p9) }
 0x4c4   : > { %1303 = vst.msk [vmem:[#allocation5 + $0x20] sm:$0xff] %vm607_vm2, %v1287_v48  ;;  %v1288_v46 = vadd.f32 %v1272_v4, %v1127_v47  ;;  %1850 = vmatprep.subr.bf16.mxu0 (!%p1752_p9), %v2328_v41  ;;  %2107 = vrcp.f32 (!%p1752_p9), %v1363_v13  ;;  %v1366_v4 = vld [vmem:[#allocation4 + $0x78] sm:$0xff] (!%p1752_p9)  ;;  %v2098_v48 = vpop.eup (!%p1752_p9), %2097  ;;  %1866 = vmatprep.mubr.msk.bf16.mxu0 (!%p1752_p9), %vm2329_vm4, %v2328_v41 }
 0x4c5   : > { %1306 = vst.msk [vmem:[#allocation5 + $0x38] sm:$0xff] %vm607_vm2, %v1290_v49  ;;  %1405 = vperm.xlu0 (!%p1752_p9), %2078, %v2092_v3   ;;  %v2100_v49 = vpop.eup (!%p1752_p9), %2099  ;;  %2109 = vrcp.f32 (!%p1752_p9), %v1366_v4 }
 0x4c6   : > { %1304 = vst.msk [vmem:[#allocation5 + $0x28] sm:$0xff] %vm607_vm2, %v1288_v46  ;;  %1420 = vperm.xlu1 (!%p1752_p9), %2079, %v2094_v44   ;;  %2111 = vrcp.f32 (!%p1752_p9), %v1365_v51  ;;  %v2102_v47 = vpop.eup (!%p1752_p9), %2101 }
 0x4c7   : > { %v2104_v23 = vpop.eup (!%p1752_p9), %2103 }
 0x4c8   : > { %v1844_v6 = vpop.f32.mrb[8].mxu1 }
 0x4c9   : > { %v1293_v28 = vadd.f32 %v1844_v6, %v1277_v26  ;;  %v1140_v54 = vpop.f32.mrb[9].mxu1  ;;  %1415 = vperm.xlu0 (!%p1752_p9), %2078, %v2096_v35   ;;  %v1490_v26 = vld [vmem:[%s3184_s6 + $0x8] sm:$0xff] (!%p1752_p9) }
 0x4ca   : > { %v1291_v45 = vadd.f32 %v1275_v24, %v1140_v54  ;;  %v1845_v33 = vpop.f32.mrb[10].mxu1  ;;  %1430 = vperm.xlu1 (!%p1752_p9), %2079, %v2098_v48   ;;  %v1489_v24 = vld [vmem:[%s3184_s6] sm:$0xff] (!%p1752_p9)  ;;  %v1336_v54 = vld [vmem:[#allocation5 + $0x8] sm:$0xff] (!%p1752_p9) }
 0x4cb   : > { %1309 = vst.msk [vmem:[#allocation5 + $0x50] sm:$0xff] %vm607_vm2, %v1293_v28  ;;  %v1294_v11 = vadd.f32 %v1845_v33, %v1278_v27  ;;  %v1143_v36 = vpop.f32.mrb[11].mxu1  ;;  %v1335_v28 = vld [vmem:[#allocation5] sm:$0xff] (!%p1752_p9) }
 0x4cc   : > { %1307 = vst.msk [vmem:[#allocation5 + $0x40] sm:$0xff] %vm607_vm2, %v1291_v45  ;;  %v1292_v19 = vadd.f32 %v1276_v31, %v1143_v36  ;;  %v1338_v36 = vld [vmem:[#allocation5 + $0x18] sm:$0xff] (!%p1752_p9) }
 0x4cd   : > { %1310 = vst.msk [vmem:[#allocation5 + $0x58] sm:$0xff] %vm607_vm2, %v1294_v11  ;;  %1425 = vperm.xlu0 (!%p1752_p9), %2078, %v2100_v49   ;;  %v2106_v46 = vpop.eup (!%p1752_p9), %2105  ;;  %v1337_v11 = vld [vmem:[#allocation5 + $0x10] sm:$0xff] (!%p1752_p9) }
 0x4ce   : > { %1308 = vst.msk [vmem:[#allocation5 + $0x48] sm:$0xff] %vm607_vm2, %v1292_v19  ;;  %1440 = vperm.xlu1 (!%p1752_p9), %2079, %v2102_v47   ;;  %v2108_v18 = vpop.eup (!%p1752_p9), %2107 }
 0x4cf   : > { %v2110_v55 = vpop.eup (!%p1752_p9), %2109 }
 0x4d0   : > { %v1848_v0 = vpop.f32.mrb[12].mxu1  ;;  %1334 = sbr.rel (%p1752_p9) target bundleno = 1634 (0x662), region = 64  ;;  %v2112_v61 = vpop.eup (!%p1752_p9), %2111 }
 0x4d1   : > { %v1297_v50 = vadd.f32 %v1848_v0, %v1281_v7  ;;  %v1156_v16 = vpop.f32.mrb[13].mxu1  ;;  %1435 = vperm.xlu0 (!%p1752_p9), %2078, %v2104_v23   ;;  %v1340_v7 = vld [vmem:[#allocation5 + $0x28] sm:$0xff] (!%p1752_p9)  ;;  %v1339_v0 = vld [vmem:[#allocation5 + $0x20] sm:$0xff] (!%p1752_p9) }
 0x4d2   : > { %v1295_v52 = vadd.f32 %v1279_v58, %v1156_v16  ;;  %v1849_v5 = vpop.f32.mrb[14].mxu1  ;;  %1450 = vperm.xlu1 (!%p1752_p9), %2079, %v2106_v46   ;;  %v1345_v53 = vld [vmem:[#allocation5 + $0x50] sm:$0xff] (!%p1752_p9) }
 0x4d3   : > { %1313 = vst.msk [vmem:[#allocation5 + $0x70] sm:$0xff] %vm607_vm2, %v1297_v50  ;;  %v1298_v30 = vadd.f32 %v1849_v5, %v1282_v17  ;;  %v1159_v1 = vpop.f32.mrb[15].mxu1  ;;  %v1342_v5 = vld [vmem:[#allocation5 + $0x38] sm:$0xff] (!%p1752_p9)  ;;  %v1343_v59 = vld [vmem:[#allocation5 + $0x40] sm:$0xff] (!%p1752_p9) }
 0x4d4   : > { %1311 = vst.msk [vmem:[#allocation5 + $0x60] sm:$0xff] %vm607_vm2, %v1295_v52  ;;  %v1296_v8 = vadd.f32 %v1280_v20, %v1159_v1  ;;  %v1341_v1 = vld [vmem:[#allocation5 + $0x30] sm:$0xff] (!%p1752_p9)  ;;  %v1346_v42 = vld [vmem:[#allocation5 + $0x58] sm:$0xff] (!%p1752_p9) }
 0x4d5   : > { %1314 = vst.msk [vmem:[#allocation5 + $0x78] sm:$0xff] %vm607_vm2, %v1298_v30  ;;  %1445 = vperm.xlu0 (!%p1752_p9), %2078, %v2108_v18   ;;  %v1344_v2 = vld [vmem:[#allocation5 + $0x48] sm:$0xff] (!%p1752_p9) }
 0x4d6   : > { %1312 = vst.msk [vmem:[#allocation5 + $0x68] sm:$0xff] %vm607_vm2, %v1296_v8  ;;  %1460 = vperm.xlu1 (!%p1752_p9), %2079, %v2110_v55  }
 0x4d9   : > { %1455 = vperm.xlu0 %2078, %v2112_v61  }
 0x4da   : > { %1498 = vperm.xlu1 %2079, %v1490_v26   ;;  %v1349_v18 = vld [vmem:[#allocation5 + $0x70] sm:$0xff] }
 0x4db   : > { %v1347_v35 = vld [vmem:[#allocation5 + $0x60] sm:$0xff] }
 0x4dc   : > { %v1350_v23 = vld [vmem:[#allocation5 + $0x78] sm:$0xff] }
 0x4dd   : > { %1493 = vperm.xlu0 %2078, %v1489_v24   ;;  %v1348_v44 = vld [vmem:[#allocation5 + $0x68] sm:$0xff] }
 0x534   : > { %v1396_v27 = vpop.permute.xlu1 %1395 }
 0x535   : > { %v1465_v19 = vmul.f32 %v1396_v27, %v1337_v11  ;;  %v2080_v27 = vld [vmem:[%s3183_s5] sm:$0xff]  }
 0x536   : > { %v1578_v11 = vld [vmem:[%s2633_s0] sm:$0xff] }
 0x53c   : > { %v1386_v6 = vpop.permute.xlu0 %1385 }
 0x53d   : > { %v1463_v45 = vmul.f32 %v1386_v6, %v1335_v28  ;;  %v1401_v10 = vpop.permute.xlu1 %1400 }
 0x53e   : > { %v1466_v60 = vmul.f32 %v1401_v10, %v1338_v36 }
 0x540   : > { %v1391_v31 = vpop.permute.xlu0 %1390  ;;  %v1482_v9 = vpack.c.bf16 %v1466_v60, %v1465_v19  ;;  %v1579_v60 = vld [vmem:[%s2633_s0 + $0x8] sm:$0xff] }
 0x541   : > { %v1464_v33 = vmul.f32 %v1391_v31, %v1336_v54  ;;  %v1411_v39 = vpop.permute.xlu1 %1410  ;;  %v1575_v31 = vstv %s1574_s11 }
 0x542   : > { %v1468_v17 = vmul.f32 %v1411_v39, %v1340_v7  ;;  %v1513_v16 = vsel %vm607_vm2, %v1482_v9, 0 }
 0x543   : > { %v1481_v37 = vpack.c.bf16 %v1464_v33, %v1463_v45 }
 0x544   : > { %v1406_v58 = vpop.permute.xlu0 %1405 }
 0x545   : > { %v1510_v21 = vsel %vm607_vm2, %v1481_v37, 0  ;;  %v1467_v50 = vmul.f32 %v1406_v58, %v1339_v0  ;;  %v1421_v52 = vpop.permute.xlu1 %1420 }
 0x546   : > { %1851 = vmatpush3.bf16.xpose.msra.mxu0 %v1510_v21  ;;  %v1470_v8 = vmul.f32 %v1421_v52, %v1342_v5 }
 0x547   : > { %1852 = vmatprep.subr.bf16.mxu0 %v2328_v41  ;;  %v1483_v20 = vpack.c.bf16 %v1468_v17, %v1467_v50 }
 0x548   : > { %v1416_v30 = vpop.permute.xlu0 %1415 }
 0x549   : > { %v1469_v12 = vmul.f32 %v1416_v30, %v1341_v1  ;;  %v1516_v34 = vsel %vm607_vm2, %v1483_v20, 0  ;;  %v1431_v22 = vpop.permute.xlu1 %1430 }
 0x54a   : > { %v1472_v29 = vmul.f32 %v1431_v22, %v1344_v2 }
 0x54b   : > { %v1484_v40 = vpack.c.bf16 %v1470_v8, %v1469_v12 }
 0x54c   : > { %v1426_v63 = vpop.permute.xlu0 %1425 }
 0x54d   : > { %v1471_v38 = vmul.f32 %v1426_v63, %v1343_v59  ;;  %v1519_v15 = vsel %vm607_vm2, %v1484_v40, 0  ;;  %v1441_v14 = vpop.permute.xlu1 %1440 }
 0x54e   : > { %1853 = vmatpush3.bf16.xpose.msra.mxu0 %v1513_v16  ;;  %v1474_v25 = vmul.f32 %v1441_v14, %v1346_v42 }
 0x54f   : > { %1854 = vmatprep.subr.bf16.mxu0 %v2328_v41  ;;  %v1485_v32 = vpack.c.bf16 %v1472_v29, %v1471_v38 }
 0x550   : > { %v1436_v57 = vpop.permute.xlu0 %1435 }
 0x551   : > { %v1473_v62 = vmul.f32 %v1436_v57, %v1345_v53  ;;  %v1522_v43 = vsel %vm607_vm2, %v1485_v32, 0  ;;  %v1451_v56 = vpop.permute.xlu1 %1450 }
 0x552   : > { %v1476_v4 = vmul.f32 %v1451_v56, %v1348_v44 }
 0x553   : > { %v1486_v3 = vpack.c.bf16 %v1474_v25, %v1473_v62 }
 0x554   : > { %v1446_v13 = vpop.permute.xlu0 %1445 }
 0x555   : > { %v1475_v48 = vmul.f32 %v1446_v13, %v1347_v35  ;;  %v1525_v51 = vsel %vm607_vm2, %v1486_v3, 0  ;;  %v1461_v47 = vpop.permute.xlu1 %1460 }
 0x556   : > { %1855 = vmatpush3.bf16.xpose.msra.mxu0 %v1516_v34  ;;  %v1478_v55 = vmul.f32 %v1461_v47, %v1350_v23 }
 0x557   : > { %1856 = vmatprep.subr.bf16.mxu0 %v2328_v41  ;;  %v1487_v49 = vpack.c.bf16 %v1476_v4, %v1475_v48 }
 0x558   : > { %v1456_v46 = vpop.permute.xlu0 %1455 }
 0x559   : > { %v1477_v61 = vmul.f32 %v1456_v46, %v1349_v18  ;;  %v1528_v26 = vsel %vm607_vm2, %v1487_v49, 0 }
 0x55b   : > { %v1488_v24 = vpack.c.bf16 %v1478_v55, %v1477_v61 }
 0x55c   : > { %v1494_v28 = vpop.permute.xlu0 %1493 }
 0x55d   : > { %v1531_v6 = vsel %vm607_vm2, %v1488_v24, 0 }
 0x55e   : > { %1857 = vmatpush3.bf16.xpose.msra.mxu0 %v1519_v15 }
 0x55f   : > { %1858 = vmatprep.subr.bf16.mxu0 %v2328_v41 }
 0x566   : > { %1859 = vmatpush3.bf16.xpose.msra.mxu0 %v1522_v43 }
 0x567   : > { %1860 = vmatprep.subr.bf16.mxu0 %v2328_v41 }
 0x56e   : > { %1861 = vmatpush3.bf16.xpose.msra.mxu0 %v1525_v51 }
 0x56f   : > { %1862 = vmatprep.subr.bf16.mxu0 %v2328_v41 }
 0x576   : > { %1863 = vmatpush3.bf16.xpose.msra.mxu0 %v1528_v26 }
 0x577   : > { %1864 = vmatprep.subr.bf16.mxu0 %v2328_v41  ;;  %v1499_v41 = vpop.permute.xlu1 %1498 }
 0x57e   : > { %1865 = vmatpush3.bf16.xpose.msra.mxu0 %v1531_v6 }
 0x585   : > { %1867 = vmatmul.mubr.msk.bf16.vlgmr.msra.gmra.mrb[0].mxu0 %vm607_vm2, %v2080_v27 }
 0x658   : > { %v1567_v54 = vpop.f32.mrb[0].mxu0 }
 0x659   : > { %v1568_v45 = vadd.f32 %v1567_v54, %v1494_v28  ;;  %v1868_v33 = vpop.f32.mrb[1].mxu0 }
 0x65a   : > { %v1570_v36 = vpop.f32.mrb[2].mxu0 }
 0x65b   : > { %v1576_v37 = vmul.f32 %v1575_v31, %v1568_v45  ;;  %v1571_v10 = vadd.f32 %v1570_v36, %v1499_v41  ;;  %v1869_v19 = vpop.f32.mrb[3].mxu0 }
 0x65d   : > { %v1580_v21 = vadd.f32 %v1578_v11, %v1576_v37  ;;  %v1577_v9 = vmul.f32 %v1575_v31, %v1571_v10 }
 0x65f   : > { %1582 = vst [vmem:[%s2647_s20] sm:$0xff] %v1580_v21  ;;  %v1581_v39 = vadd.f32 %v1579_v60, %v1577_v9 }
 0x661   : > { %1583 = vst [vmem:[%s2647_s20 + $0x8] sm:$0xff] %v1581_v39 }
 0x662 PF: > { %s3232_s25 = sld [smem:[#allocation18_spill]]  ;;  %s3233_s19 = sld [smem:[#allocation17_spill]] }
 0x663   : > { %s3234_s1 = sld [smem:[#allocation21_spill]]  ;;  %s1599_s18 = sshll.u32 %s2647_s20, 4  ;;  %s3098_s18 = int_to_ptr.vmem [resolvable:$true] %s1599_s18 }
 0x664   : > { %s3235_s0 = sld [smem:[#allocation26_spill]]  ;;  %s1585_s16 = scalar_lea.sflag [#allocation9], %s2629_s17 }
 0x665   : > { %s2173_s21 = scalar_lea.vmem %s3098_s18, 256  ;;  %s2330_s11 = smov [#allocation12]  }
 0x666   : > { %p2174_p2 = scmp.ne.s32.totalorder %s3098_s18, %s2173_s21 }
 0x668   : > { %s1756_s22 = sshll.u32 %s3232_s25, 2  ;;  %s2177_s25 = sshll.u32 %s2330_s11, 4  ;;  %s2178_s25 = int_to_ptr.vmem [resolvable:$false] %s2177_s25 }
 0x669   : > { %s1596_s7 = sadd.s32 %s3233_s19, %s1756_s22  ;;  %p3237_p4 = scmp.ne.s32.totalorder %s3234_s1, 0 }
 0x66a   : > { %s1757_s12 = sshll.u32 %s1596_s7, 7  ;;  %s3236_s24 = smov %s3235_s0 }
 0x66b   : > { %s3103_s10 = scalar_lea.hbm %s3235_s0, %s1757_s12  ;;  %p2175_p3 = pnand %p2174_p2, %p3237_p4 }
 0x66c   : > { %s2179_s20 = scalar_lea.vmem %s2178_s25, 512  ;;  %p2180_p10 = scmp.lt.s32.totalorder %s3098_s18, %s2178_s25 }
 0x66d   : > { %p2176_p5 = pneg %p2175_p3  ;;  %p2181_p7 = scmp.lt.s32.totalorder %s2179_s20, %s2173_s21 }
 0x66f   : > { %p2182_p13 = por %p2181_p7, %p2180_p10 }
 0x671   : > { %p2183_p11 = pnand %p2182_p13, %p2176_p5 }
 0x673   : > { %2186 = shalt.err (!%p2183_p11)
}
 0x674   : > { %s2187_s19 = scalar_lea.hbm %s3103_s10, 256  ;;  %s2191_s12 = scalar_lea.hbm %s3236_s24, 1024 }
 0x675   : > { %p2188_p6 = scmp.ne.s32.totalorder %s3103_s10, %s2187_s19  ;;  %p2192_p8 = scmp.lt.u32.totalorder %s3103_s10, %s3236_s24 }
 0x676   : > { %p2193_p1 = scmp.lt.u32.totalorder %s2191_s12, %s2187_s19  ;;  %p2195_p2 = scmp.lt.u32.totalorder %s2187_s19, %s3103_s10 }
 0x677   : > { %p2189_p12 = pnand %p2188_p6, %p3237_p4 }
 0x678   : > { %p2194_p9 = por %p2193_p1, %p2192_p8 }
 0x679   : > { %p2190_p0 = pneg %p2189_p12 }
 0x67a   : > { %p2196_p3 = por %p2195_p2, %p2194_p9 }
 0x67c   : > { %p2197_p5 = pnand %p2196_p3, %p2190_p0 }
 0x67e   : > { %2200 = shalt.err (!%p2197_p5)
}
 0x67f   : > { %s2331_s0 = smov 128   ;;  %s2332_s21 = smov 256  }
 0x680   : > { %s2333_s11 = smov 8  }
 0x681   : > { %1876 = dma.vmem_to_hbm [thread:$0]  (%p3237_p4), %s3098_s18, 256, %s3103_s10, %s1585_s16, %s2331_s0, %s2332_s21, %s2333_s11  }
 0x682 PF: > { %s3238_s25 = sld [smem:[#allocation16_spill]]  ;;  %s3239_s20 = sld [smem:[#allocation22_spill]] }
 0x683   : > { %p1890_p10 = scmp.ge.s32.totalorder %s2315_s14, 2 }
 0x688   : > { %s1614_s22 = sand.u32 1, %s3238_s25   ;;  %p3240_p7 = scmp.ne.s32.totalorder %s3239_s20, 0 }
 0x689   : > { %s1615_s19 = scalar_lea.sflag [#allocation9], %s1614_s22 }
 0x68a   : > { %p1886_p13 = pnand %p1890_p10, %p3240_p7 }
 0x68c   : > { %2262 = dma.done.wait (!%p1886_p13), %s1615_s19, 256  }
 0x68d   : > { %2264 = vsyncadd (!%p1886_p13), %s1615_s19, 4294967040  ;;  %s27_s14 = sadd.s32 1, %s2315_s14   ;;  %s3242_s17 = smov %s2595_s26 }
 0x68e   : > { %p3134_p11 = scmp.ge.s32.totalorder %s27_s14, 10   ;;  %s3243_s1 = smov %s2590_s29 }
 0x68f   : > { %s3244_s9 = sld [smem:[#allocation19_spill]]  ;;  %s3245_s0 = sld [smem:[#allocation20_spill]] }
 0x690   : > { %s3246_s11 = sld [smem:[#allocation23_spill]]  ;;  %s3247_s12 = sld [smem:[#allocation24_spill]] }
 0x691   : > { %s3248_s26 = smov %s2271_s27  ;;  %s3249_s27 = smov %s2275_s28 }
 0x692   : > { %s3250_s28 = smov %s3242_s17  ;;  %s3251_s29 = smov %s2283_s30 }
 0x693   : > { %s3252_s30 = smov %s2287_s8  ;;  %s3253_s8 = smov %s3243_s1 }
 0x694   : > { %s3254_s10 = smov %s2311_s13  ;;  %s3255_s13 = smov %s3265_s15 }
 0x695   :  { %26 = sbr.rel (!%p3134_p11) target bundleno = 16 (0x10), region = 114 }
 0x69c   :  { %1620 = vsyncpa [#allocation8], 1 }
 0x69d   :  { %1622 = vsyncpa [#allocation8 + $0x1], 1 }
 0x69e   :  { %1623 = vsyncpa [#allocation11], 1 }
 0x69f   :  { %1625 = vsyncpa [#allocation11 + $0x1], 1 }
 0x6a0   :  { %1626 = vsyncpa [#allocation9], 1 }
 0x6a1   :  { %1628 = vsyncpa [#allocation9 + $0x1], 1 }

</bundles_post_ra>
